<compile_context>
chip_gen: v6e
topology: v6e:2x2x1
jax: 0.10.0
libtpu: 0.0.40
codegen_flags: <defaults>
</compile_context>

<pallas_src>
from functools import partial

import numpy as np
import jax
import jax.numpy as jnp
from jax import lax
from jax.experimental import pallas as pl
from jax.experimental.pallas import tpu as pltpu

BN_EPS = 1e-5


# ---------------------------------------------------------------------------
# Pallas kernel: whole ShuffleNetUnitB forward for `block_b` images per step.
# Layout: channels (x batch) in sublanes, pixels in lanes.
# ---------------------------------------------------------------------------
def shufflenet_unit_b_kernel(x_ref, pool_mat_ref, tap_mat_ref, w1_ref, b1_ref,
                             wdw_ref, b4_ref, w5_ref, b5_ref,
                             pool_out_ref, main_out_ref):
    x = x_ref[...]                                        # (Bt*C_in, H*W)
    np_out = pool_mat_ref.shape[1]                        # Ho*Wo

    # ---- skip branch: 3x3 / stride-2 avg-pool (count_include_pad=True).
    # Tap sum and the 1/9 divisor are folded into pool_mat host-side.
    pooled = jnp.dot(x, pool_mat_ref[...], preferred_element_type=jnp.float32)
    pool_out_ref[...] = jnp.maximum(pooled, 0.0).astype(pool_out_ref.dtype)

    # ---- main branch --------------------------------------------------------
    # 1x1 group conv + BN2 + ReLU + channel shuffle (all folded into w1/b1,
    # block-diagonal across the Bt images of this step).  N = H*W lanes.
    t1 = jnp.dot(w1_ref[...], x, preferred_element_type=jnp.float32) + b1_ref[...]
    t1 = jnp.maximum(t1, 0.0)                             # (Bt*C_b, H*W)

    # 3x3 stride-2 depthwise conv + BN4: one 0/1 gather matmul per tap
    # (shared across channels & images), per-channel tap weight on the VPU.
    wdw = wdw_ref[...]                                    # (Bt*C_b, 9)
    acc = jnp.zeros((t1.shape[0], np_out), jnp.float32)
    for k in range(wdw.shape[1]):                         # static unrolled, 9 taps
        tap = jnp.dot(t1, tap_mat_ref[k], preferred_element_type=jnp.float32)
        acc = acc + tap * wdw[:, k:k + 1]
    dw = acc + b4_ref[...]                                # (Bt*C_b, Np)

    # 1x1 group conv + BN6 (folded, block-diagonal) + ReLU from the final cat.
    t5 = jnp.dot(w5_ref[...], dw, preferred_element_type=jnp.float32) + b5_ref[...]
    main_out_ref[...] = jnp.maximum(t5, 0.0).astype(main_out_ref.dtype)


# ---------------------------------------------------------------------------
# Host-side one-time packing (weight folding + gather matrices). For a real
# model this runs once at parameter-setup time, not per forward call.
# ---------------------------------------------------------------------------
def build_gather_matrices(H, W, Ho, Wo, stride=2, pad=1, ksize=3):
    """Returns (pool_mat, tap_mat):
       pool_mat: (H*W, Np)     -- 3x3/s2 avg-pool incl. 1/9 divisor.
       tap_mat:  (9, H*W, Np)  -- 0/1 gather matrix per 3x3 tap (zero padding).
    """
    Np = Ho * Wo
    tap = np.zeros((ksize * ksize, H * W, Np), dtype=np.float32)
    for kh in range(ksize):
        for kw in range(ksize):
            k = kh * ksize + kw
            for oh in range(Ho):
                for ow in range(Wo):
                    ih = stride * oh + kh - pad
                    iw = stride * ow + kw - pad
                    if 0 <= ih < H and 0 <= iw < W:
                        tap[k, ih * W + iw, oh * Wo + ow] = 1.0
    pool_mat = tap.sum(axis=0) / float(ksize * ksize)
    return jnp.asarray(pool_mat), jnp.asarray(tap)


def _group_conv_dense(w, c_in, c_out, groups):
    """Grouped 1x1 conv weight (c_out, c_in//groups, 1, 1) -> dense (c_out, c_in)."""
    w = np.asarray(w)[:, :, 0, 0]
    cin_g, cout_g = c_in // groups, c_out // groups
    dense = np.zeros((c_out, c_in), np.float32)
    for g in range(groups):
        dense[g * cout_g:(g + 1) * cout_g, g * cin_g:(g + 1) * cin_g] = \
            w[g * cout_g:(g + 1) * cout_g, :]
    return dense


def pack_params(p, c_in, c_mid, groups, block_b, eps=BN_EPS):
    c_b = c_mid // 4

    def bn_fold(gamma, beta, mean, var):
        s = np.asarray(gamma) / np.sqrt(np.asarray(var) + eps)
        return s, np.asarray(beta) - np.asarray(mean) * s

    # conv1 + BN2, channel shuffle folded into the output rows.
    s2, t2 = bn_fold(p['g2'], p['be2'], p['m2'], p['v2'])
    w1f = _group_conv_dense(p['w1'], c_in, c_b, groups) * s2[:, None]
    b1f = np.asarray(p['b1']) * s2 + t2
    cpg = c_b // groups
    perm = np.array([g * cpg + i for i in range(cpg) for g in range(groups)])
    w1k, b1k = w1f[perm, :], b1f[perm]

    # depthwise conv3 + BN4 (channel index is already post-shuffle).
    s4, t4 = bn_fold(p['g4'], p['be4'], p['m4'], p['v4'])
    wdw = np.asarray(p['w3'])[:, 0].reshape(c_b, 9) * s4[:, None]      # (C_b, 9)
    b4f = np.asarray(p['b3']) * s4 + t4

    # conv5 + BN6.
    s6, t6 = bn_fold(p['g6'], p['be6'], p['m6'], p['v6'])
    w5f = _group_conv_dense(p['w5'], c_b, c_mid, groups) * s6[:, None]
    b5f = np.asarray(p['b5']) * s6 + t6

    # Expand for a block of `block_b` images stacked along sublanes: the x
    # block is (block_b*C_in, H*W), so the 1x1 convs become block-diagonal.
    eye = np.eye(block_b, dtype=np.float32)
    return dict(
        w1=jnp.asarray(np.kron(eye, w1k)),                 # (Bt*C_b, Bt*C_in)
        b1=jnp.asarray(np.tile(b1k, block_b)[:, None]),    # (Bt*C_b, 1)
        wdw=jnp.asarray(np.tile(wdw, (block_b, 1))),       # (Bt*C_b, 9)
        b4=jnp.asarray(np.tile(b4f, block_b)[:, None]),    # (Bt*C_b, 1)
        w5=jnp.asarray(np.kron(eye, w5f)),                 # (Bt*C_mid, Bt*C_b)
        b5=jnp.asarray(np.tile(b5f, block_b)[:, None]),    # (Bt*C_mid, 1)
    )


# ---------------------------------------------------------------------------
# Forward wrapper (NCHW in / NCHW out, matching the PyTorch module).
# No transposes: only free reshapes around the pallas_call.
# ---------------------------------------------------------------------------
@partial(jax.jit, static_argnames=("block_b",))
def shufflenet_unit_b_forward(x_nchw, packed, pool_mat, tap_mat, block_b):
    B, C_in, H, W = x_nchw.shape
    HW = H * W
    Np = pool_mat.shape[1]
    Ho = (H + 2 - 3) // 2 + 1
    Wo = (W + 2 - 3) // 2 + 1
    assert Ho * Wo == Np
    bc_in = block_b * C_in
    bc_b = packed['w1'].shape[0]
    bc_mid = packed['w5'].shape[0]
    C_mid = bc_mid // block_b
    # Sublane-dim layout rule for the per-step blocks.
    assert bc_in % 8 == 0 and bc_b % 8 == 0 and bc_mid % 8 == 0

    n_blocks = -(-B // block_b)
    B_pad = n_blocks * block_b
    x3 = x_nchw.reshape(B, C_in, HW)
    if B_pad != B:
        x3 = jnp.concatenate(
            [x3, jnp.zeros((B_pad - B, C_in, HW), x3.dtype)], axis=0)
    x2 = x3.reshape(B_pad * C_in, HW)          # free reshape, no transpose

    def const_spec(arr):
        zeros = (0,) * arr.ndim
        return pl.BlockSpec(arr.shape, lambda i: zeros)

    pool_flat, main_flat = pl.pallas_call(
        shufflenet_unit_b_kernel,
        out_shape=(jax.ShapeDtypeStruct((B_pad * C_in, Np), x_nchw.dtype),
                   jax.ShapeDtypeStruct((B_pad * C_mid, Np), x_nchw.dtype)),
        grid=(n_blocks,),
        in_specs=[
            pl.BlockSpec((bc_in, HW), lambda i: (i, 0)),
            const_spec(pool_mat),
            const_spec(tap_mat),
            const_spec(packed['w1']),
            const_spec(packed['b1']),
            const_spec(packed['wdw']),
            const_spec(packed['b4']),
            const_spec(packed['w5']),
            const_spec(packed['b5']),
        ],
        out_specs=(pl.BlockSpec((bc_in, Np), lambda i: (i, 0)),
                   pl.BlockSpec((bc_mid, Np), lambda i: (i, 0))),
        compiler_params=pltpu.CompilerParams(
            dimension_semantics=("parallel",)),
    )(x2, pool_mat, tap_mat, packed['w1'], packed['b1'], packed['wdw'],
      packed['b4'], packed['w5'], packed['b5'])

    pooled = pool_flat.reshape(B_pad, C_in, Ho, Wo)[:B]
    main = main_flat.reshape(B_pad, C_mid, Ho, Wo)[:B]
    return jnp.concatenate([pooled, main], axis=1)


# ---------------------------------------------------------------------------
# Pure-JAX reference mirroring the PyTorch module (eval-mode BatchNorm).
# ---------------------------------------------------------------------------
def shufflenet_unit_b_reference(x, p, groups, eps=BN_EPS):
    def bn(y, gamma, beta, mean, var):
        return ((y - mean[None, :, None, None])
                / jnp.sqrt(var[None, :, None, None] + eps)
                * gamma[None, :, None, None] + beta[None, :, None, None])

    dn = ('NCHW', 'OIHW', 'NCHW')
    out = lax.conv_general_dilated(x, p['w1'], (1, 1), 'VALID',
                                   dimension_numbers=dn,
                                   feature_group_count=groups)
    out = out + p['b1'][None, :, None, None]
    out = jax.nn.relu(bn(out, p['g2'], p['be2'], p['m2'], p['v2']))

    B, C, H, W = out.shape
    cpg = C // groups
    out = out.reshape(B, groups, cpg, H, W).transpose(0, 2, 1, 3, 4).reshape(B, C, H, W)

    out = lax.conv_general_dilated(out, p['w3'], (2, 2), ((1, 1), (1, 1)),
                                   dimension_numbers=dn,
                                   feature_group_count=C)
    out = out + p['b3'][None, :, None, None]
    out = bn(out, p['g4'], p['be4'], p['m4'], p['v4'])

    out = lax.conv_general_dilated(out, p['w5'], (1, 1), 'VALID',
                                   dimension_numbers=dn,
                                   feature_group_count=groups)
    out = out + p['b5'][None, :, None, None]
    out = bn(out, p['g6'], p['be6'], p['m6'], p['v6'])

    pooled = lax.reduce_window(x, 0.0, lax.add, (1, 1, 3, 3), (1, 1, 2, 2),
                               ((0, 0), (0, 0), (1, 1), (1, 1))) / 9.0
    return jax.nn.relu(jnp.concatenate([pooled, out], axis=1))


if __name__ == "__main__":
    # Shapes consistent with the module constraints:
    #   groups=3, in_channels=12, out_channels(arg)=60 -> C_mid=48, C_b=12.
    B, C_in, H, W = 8, 12, 16, 16
    groups = 3
    out_channels_arg = 60
    C_mid = out_channels_arg - C_in      # 48
    C_b = C_mid // 4                     # 12
    block_b = 4                          # images per grid step -> grid=(2,)

    key = jax.random.PRNGKey(0)
    ks = jax.random.split(key, 20)

    def nrm(k, shape, scale=0.1):
        return scale * jax.random.normal(k, shape, jnp.float32)

    def uni(k, shape, lo, hi):
        return jax.random.uniform(k, shape, jnp.float32, lo, hi)

    params = dict(
        w1=nrm(ks[0], (C_b, C_in // groups, 1, 1), 0.2),
        b1=nrm(ks[1], (C_b,), 0.1),
        g2=uni(ks[2], (C_b,), 0.5, 1.5), be2=nrm(ks[3], (C_b,)),
        m2=nrm(ks[4], (C_b,)), v2=uni(ks[5], (C_b,), 0.5, 1.5),
        w3=nrm(ks[6], (C_b, 1, 3, 3), 0.2),
        b3=nrm(ks[7], (C_b,), 0.1),
        g4=uni(ks[8], (C_b,), 0.5, 1.5), be4=nrm(ks[9], (C_b,)),
        m4=nrm(ks[10], (C_b,)), v4=uni(ks[11], (C_b,), 0.5, 1.5),
        w5=nrm(ks[12], (C_mid, C_b // groups, 1, 1), 0.2),
        b5=nrm(ks[13], (C_mid,), 0.1),
        g6=uni(ks[14], (C_mid,), 0.5, 1.5), be6=nrm(ks[15], (C_mid,)),
        m6=nrm(ks[16], (C_mid,)), v6=uni(ks[17], (C_mid,), 0.5, 1.5),
    )
    x = jax.random.normal(ks[18], (B, C_in, H, W), jnp.float32)

    # One-time packing of weights + gather matrices.
    packed = pack_params(params, C_in, C_mid, groups, block_b)
    Ho = (H + 2 - 3) // 2 + 1
    Wo = (W + 2 - 3) // 2 + 1
    pool_mat, tap_mat = build_gather_matrices(H, W, Ho, Wo)

    out = shufflenet_unit_b_forward(x, packed, pool_mat, tap_mat, block_b)
    out = jax.block_until_ready(out)

    ref = shufflenet_unit_b_reference(x, params, groups)
    ref = jax.block_until_ready(ref)

    assert out.shape == ref.shape, (out.shape, ref.shape)
    max_err = float(jnp.max(jnp.abs(out - ref)))
    assert max_err < 5e-4, f"max abs error {max_err}"
    print("KERNEL_OK")
</pallas_src>

<mosaic_0001>
module attributes {stable_mosaic.version = 11 : i64} {
  func.func @shufflenet_unit_b_kernel(%arg0: i32, %arg1: memref<48x256xf32, #tpu.memory_space<vmem>>, %arg2: memref<256x64xf32, #tpu.memory_space<vmem>>, %arg3: memref<9x256x64xf32, #tpu.memory_space<vmem>>, %arg4: memref<48x48xf32, #tpu.memory_space<vmem>>, %arg5: memref<48x1xf32, #tpu.memory_space<vmem>>, %arg6: memref<48x9xf32, #tpu.memory_space<vmem>>, %arg7: memref<48x1xf32, #tpu.memory_space<vmem>>, %arg8: memref<192x48xf32, #tpu.memory_space<vmem>>, %arg9: memref<192x1xf32, #tpu.memory_space<vmem>>, %arg10: memref<48x64xf32, #tpu.memory_space<vmem>>, %arg11: memref<192x64xf32, #tpu.memory_space<vmem>>) attributes {dimension_semantics = [#tpu.dimension_semantics<parallel>], iteration_bounds = array<i64: 2>, scalar_prefetch = 0 : i64, scratch_operands = 0 : i64, tpu.core_type = #tpu.core_type<tc>, window_params = [{transform_indices = @transform_0, window_bounds = array<i64: 48, 256>}, {pipeline_mode = #tpu.pipeline_mode<synchronous>, transform_indices = @transform_1, window_bounds = array<i64: 256, 64>}, {pipeline_mode = #tpu.pipeline_mode<synchronous>, transform_indices = @transform_2, window_bounds = array<i64: 9, 256, 64>}, {pipeline_mode = #tpu.pipeline_mode<synchronous>, transform_indices = @transform_3, window_bounds = array<i64: 48, 48>}, {pipeline_mode = #tpu.pipeline_mode<synchronous>, transform_indices = @transform_4, window_bounds = array<i64: 48, 1>}, {pipeline_mode = #tpu.pipeline_mode<synchronous>, transform_indices = @transform_5, window_bounds = array<i64: 48, 9>}, {pipeline_mode = #tpu.pipeline_mode<synchronous>, transform_indices = @transform_6, window_bounds = array<i64: 48, 1>}, {pipeline_mode = #tpu.pipeline_mode<synchronous>, transform_indices = @transform_7, window_bounds = array<i64: 192, 48>}, {pipeline_mode = #tpu.pipeline_mode<synchronous>, transform_indices = @transform_8, window_bounds = array<i64: 192, 1>}, {transform_indices = @transform_9, window_bounds = array<i64: 48, 64>}, {transform_indices = @transform_10, window_bounds = array<i64: 192, 64>}]} {
    %c0 = arith.constant 0 : index
    %c0_0 = arith.constant 0 : index
    %0 = vector.load %arg1[%c0, %c0_0] : memref<48x256xf32, #tpu.memory_space<vmem>>, vector<48x256xf32>
    %c0_1 = arith.constant 0 : index
    %c0_2 = arith.constant 0 : index
    %1 = vector.load %arg2[%c0_1, %c0_2] : memref<256x64xf32, #tpu.memory_space<vmem>>, vector<256x64xf32>
    %cst = arith.constant dense<0.000000e+00> : vector<48x64xf32>
    %2 = tpu.matmul %0, %1, %cst {dimension_numbers = #tpu.dot_dimension_numbers<[1], [0], [0], [1], [0, 0, 1, 1], [], []>} : vector<48x256xf32>, vector<256x64xf32>, vector<48x64xf32> -> vector<48x64xf32>
    %cst_3 = arith.constant 0.000000e+00 : f32
    %3 = vector.broadcast %cst_3 : f32 to vector<48x64xf32>
    %4 = arith.maximumf %2, %3 : vector<48x64xf32>
    %c0_4 = arith.constant 0 : index
    %c0_5 = arith.constant 0 : index
    %5 = vector.load %arg10[%c0_4, %c0_5] : memref<48x64xf32, #tpu.memory_space<vmem>>, vector<48x64xf32>
    tpu.vector_store %arg10[%c0_4, %c0_5], %4 {strides = array<i32>} : memref<48x64xf32, #tpu.memory_space<vmem>>, vector<48x64xf32>,
    %c0_6 = arith.constant 0 : index
    %c0_7 = arith.constant 0 : index
    %6 = vector.load %arg4[%c0_6, %c0_7] : memref<48x48xf32, #tpu.memory_space<vmem>>, vector<48x48xf32>
    %cst_8 = arith.constant dense<0.000000e+00> : vector<48x256xf32>
    %7 = tpu.matmul %6, %0, %cst_8 {dimension_numbers = #tpu.dot_dimension_numbers<[1], [0], [0], [1], [0, 0, 1, 1], [], []>} : vector<48x48xf32>, vector<48x256xf32>, vector<48x256xf32> -> vector<48x256xf32>
    %c0_9 = arith.constant 0 : index
    %c0_10 = arith.constant 0 : index
    %8 = vector.load %arg5[%c0_9, %c0_10] : memref<48x1xf32, #tpu.memory_space<vmem>>, vector<48x1xf32>
    %9 = vector.broadcast %8 : vector<48x1xf32> to vector<48x256xf32>
    %10 = arith.addf %7, %9 : vector<48x256xf32>
    %cst_11 = arith.constant 0.000000e+00 : f32
    %11 = vector.broadcast %cst_11 : f32 to vector<48x256xf32>
    %12 = arith.maximumf %10, %11 : vector<48x256xf32>
    %c0_12 = arith.constant 0 : index
    %c0_13 = arith.constant 0 : index
    %13 = vector.load %arg6[%c0_12, %c0_13] : memref<48x9xf32, #tpu.memory_space<vmem>>, vector<48x9xf32>
    %cst_14 = arith.constant 0.000000e+00 : f32
    %14 = vector.broadcast %cst_14 : f32 to vector<48x64xf32>
    %c0_15 = arith.constant 0 : index
    %c0_16 = arith.constant 0 : index
    %c0_17 = arith.constant 0 : index
    %15 = vector.load %arg3[%c0_15, %c0_16, %c0_17] : memref<9x256x64xf32, #tpu.memory_space<vmem>>, vector<1x256x64xf32>
    %16 = vector.shape_cast %15 : vector<1x256x64xf32> to vector<256x64xf32>
    %cst_18 = arith.constant dense<0.000000e+00> : vector<48x64xf32>
    %17 = tpu.matmul %12, %16, %cst_18 {dimension_numbers = #tpu.dot_dimension_numbers<[1], [0], [0], [1], [0, 0, 1, 1], [], []>} : vector<48x256xf32>, vector<256x64xf32>, vector<48x64xf32> -> vector<48x64xf32>
    %18 = vector.extract_strided_slice %13 {offsets = [0, 0], sizes = [48, 1], strides = [1, 1]} : vector<48x9xf32> to vector<48x1xf32>
    %19 = vector.broadcast %18 : vector<48x1xf32> to vector<48x64xf32>
    %20 = arith.mulf %17, %19 : vector<48x64xf32>
    %21 = arith.addf %14, %20 : vector<48x64xf32>
    %c1 = arith.constant 1 : index
    %c0_19 = arith.constant 0 : index
    %c0_20 = arith.constant 0 : index
    %22 = vector.load %arg3[%c1, %c0_19, %c0_20] : memref<9x256x64xf32, #tpu.memory_space<vmem>>, vector<1x256x64xf32>
    %23 = vector.shape_cast %22 : vector<1x256x64xf32> to vector<256x64xf32>
    %cst_21 = arith.constant dense<0.000000e+00> : vector<48x64xf32>
    %24 = tpu.matmul %12, %23, %cst_21 {dimension_numbers = #tpu.dot_dimension_numbers<[1], [0], [0], [1], [0, 0, 1, 1], [], []>} : vector<48x256xf32>, vector<256x64xf32>, vector<48x64xf32> -> vector<48x64xf32>
    %25 = vector.extract_strided_slice %13 {offsets = [0, 1], sizes = [48, 1], strides = [1, 1]} : vector<48x9xf32> to vector<48x1xf32>
    %26 = vector.broadcast %25 : vector<48x1xf32> to vector<48x64xf32>
    %27 = arith.mulf %24, %26 : vector<48x64xf32>
    %28 = arith.addf %21, %27 : vector<48x64xf32>
    %c2 = arith.constant 2 : index
    %c0_22 = arith.constant 0 : index
    %c0_23 = arith.constant 0 : index
    %29 = vector.load %arg3[%c2, %c0_22, %c0_23] : memref<9x256x64xf32, #tpu.memory_space<vmem>>, vector<1x256x64xf32>
    %30 = vector.shape_cast %29 : vector<1x256x64xf32> to vector<256x64xf32>
    %cst_24 = arith.constant dense<0.000000e+00> : vector<48x64xf32>
    %31 = tpu.matmul %12, %30, %cst_24 {dimension_numbers = #tpu.dot_dimension_numbers<[1], [0], [0], [1], [0, 0, 1, 1], [], []>} : vector<48x256xf32>, vector<256x64xf32>, vector<48x64xf32> -> vector<48x64xf32>
    %32 = vector.extract_strided_slice %13 {offsets = [0, 2], sizes = [48, 1], strides = [1, 1]} : vector<48x9xf32> to vector<48x1xf32>
    %33 = vector.broadcast %32 : vector<48x1xf32> to vector<48x64xf32>
    %34 = arith.mulf %31, %33 : vector<48x64xf32>
    %35 = arith.addf %28, %34 : vector<48x64xf32>
    %c3 = arith.constant 3 : index
    %c0_25 = arith.constant 0 : index
    %c0_26 = arith.constant 0 : index
    %36 = vector.load %arg3[%c3, %c0_25, %c0_26] : memref<9x256x64xf32, #tpu.memory_space<vmem>>, vector<1x256x64xf32>
    %37 = vector.shape_cast %36 : vector<1x256x64xf32> to vector<256x64xf32>
    %cst_27 = arith.constant dense<0.000000e+00> : vector<48x64xf32>
    %38 = tpu.matmul %12, %37, %cst_27 {dimension_numbers = #tpu.dot_dimension_numbers<[1], [0], [0], [1], [0, 0, 1, 1], [], []>} : vector<48x256xf32>, vector<256x64xf32>, vector<48x64xf32> -> vector<48x64xf32>
    %39 = vector.extract_strided_slice %13 {offsets = [0, 3], sizes = [48, 1], strides = [1, 1]} : vector<48x9xf32> to vector<48x1xf32>
    %40 = vector.broadcast %39 : vector<48x1xf32> to vector<48x64xf32>
    %41 = arith.mulf %38, %40 : vector<48x64xf32>
    %42 = arith.addf %35, %41 : vector<48x64xf32>
    %c4 = arith.constant 4 : index
    %c0_28 = arith.constant 0 : index
    %c0_29 = arith.constant 0 : index
    %43 = vector.load %arg3[%c4, %c0_28, %c0_29] : memref<9x256x64xf32, #tpu.memory_space<vmem>>, vector<1x256x64xf32>
    %44 = vector.shape_cast %43 : vector<1x256x64xf32> to vector<256x64xf32>
    %cst_30 = arith.constant dense<0.000000e+00> : vector<48x64xf32>
    %45 = tpu.matmul %12, %44, %cst_30 {dimension_numbers = #tpu.dot_dimension_numbers<[1], [0], [0], [1], [0, 0, 1, 1], [], []>} : vector<48x256xf32>, vector<256x64xf32>, vector<48x64xf32> -> vector<48x64xf32>
    %46 = vector.extract_strided_slice %13 {offsets = [0, 4], sizes = [48, 1], strides = [1, 1]} : vector<48x9xf32> to vector<48x1xf32>
    %47 = vector.broadcast %46 : vector<48x1xf32> to vector<48x64xf32>
    %48 = arith.mulf %45, %47 : vector<48x64xf32>
    %49 = arith.addf %42, %48 : vector<48x64xf32>
    %c5 = arith.constant 5 : index
    %c0_31 = arith.constant 0 : index
    %c0_32 = arith.constant 0 : index
    %50 = vector.load %arg3[%c5, %c0_31, %c0_32] : memref<9x256x64xf32, #tpu.memory_space<vmem>>, vector<1x256x64xf32>
    %51 = vector.shape_cast %50 : vector<1x256x64xf32> to vector<256x64xf32>
    %cst_33 = arith.constant dense<0.000000e+00> : vector<48x64xf32>
    %52 = tpu.matmul %12, %51, %cst_33 {dimension_numbers = #tpu.dot_dimension_numbers<[1], [0], [0], [1], [0, 0, 1, 1], [], []>} : vector<48x256xf32>, vector<256x64xf32>, vector<48x64xf32> -> vector<48x64xf32>
    %53 = vector.extract_strided_slice %13 {offsets = [0, 5], sizes = [48, 1], strides = [1, 1]} : vector<48x9xf32> to vector<48x1xf32>
    %54 = vector.broadcast %53 : vector<48x1xf32> to vector<48x64xf32>
    %55 = arith.mulf %52, %54 : vector<48x64xf32>
    %56 = arith.addf %49, %55 : vector<48x64xf32>
    %c6 = arith.constant 6 : index
    %c0_34 = arith.constant 0 : index
    %c0_35 = arith.constant 0 : index
    %57 = vector.load %arg3[%c6, %c0_34, %c0_35] : memref<9x256x64xf32, #tpu.memory_space<vmem>>, vector<1x256x64xf32>
    %58 = vector.shape_cast %57 : vector<1x256x64xf32> to vector<256x64xf32>
    %cst_36 = arith.constant dense<0.000000e+00> : vector<48x64xf32>
    %59 = tpu.matmul %12, %58, %cst_36 {dimension_numbers = #tpu.dot_dimension_numbers<[1], [0], [0], [1], [0, 0, 1, 1], [], []>} : vector<48x256xf32>, vector<256x64xf32>, vector<48x64xf32> -> vector<48x64xf32>
    %60 = vector.extract_strided_slice %13 {offsets = [0, 6], sizes = [48, 1], strides = [1, 1]} : vector<48x9xf32> to vector<48x1xf32>
    %61 = vector.broadcast %60 : vector<48x1xf32> to vector<48x64xf32>
    %62 = arith.mulf %59, %61 : vector<48x64xf32>
    %63 = arith.addf %56, %62 : vector<48x64xf32>
    %c7 = arith.constant 7 : index
    %c0_37 = arith.constant 0 : index
    %c0_38 = arith.constant 0 : index
    %64 = vector.load %arg3[%c7, %c0_37, %c0_38] : memref<9x256x64xf32, #tpu.memory_space<vmem>>, vector<1x256x64xf32>
    %65 = vector.shape_cast %64 : vector<1x256x64xf32> to vector<256x64xf32>
    %cst_39 = arith.constant dense<0.000000e+00> : vector<48x64xf32>
    %66 = tpu.matmul %12, %65, %cst_39 {dimension_numbers = #tpu.dot_dimension_numbers<[1], [0], [0], [1], [0, 0, 1, 1], [], []>} : vector<48x256xf32>, vector<256x64xf32>, vector<48x64xf32> -> vector<48x64xf32>
    %67 = vector.extract_strided_slice %13 {offsets = [0, 7], sizes = [48, 1], strides = [1, 1]} : vector<48x9xf32> to vector<48x1xf32>
    %68 = vector.broadcast %67 : vector<48x1xf32> to vector<48x64xf32>
    %69 = arith.mulf %66, %68 : vector<48x64xf32>
    %70 = arith.addf %63, %69 : vector<48x64xf32>
    %c8 = arith.constant 8 : index
    %c0_40 = arith.constant 0 : index
    %c0_41 = arith.constant 0 : index
    %71 = vector.load %arg3[%c8, %c0_40, %c0_41] : memref<9x256x64xf32, #tpu.memory_space<vmem>>, vector<1x256x64xf32>
    %72 = vector.shape_cast %71 : vector<1x256x64xf32> to vector<256x64xf32>
    %cst_42 = arith.constant dense<0.000000e+00> : vector<48x64xf32>
    %73 = tpu.matmul %12, %72, %cst_42 {dimension_numbers = #tpu.dot_dimension_numbers<[1], [0], [0], [1], [0, 0, 1, 1], [], []>} : vector<48x256xf32>, vector<256x64xf32>, vector<48x64xf32> -> vector<48x64xf32>
    %74 = vector.extract_strided_slice %13 {offsets = [0, 8], sizes = [48, 1], strides = [1, 1]} : vector<48x9xf32> to vector<48x1xf32>
    %75 = vector.broadcast %74 : vector<48x1xf32> to vector<48x64xf32>
    %76 = arith.mulf %73, %75 : vector<48x64xf32>
    %77 = arith.addf %70, %76 : vector<48x64xf32>
    %c0_43 = arith.constant 0 : index
    %c0_44 = arith.constant 0 : index
    %78 = vector.load %arg7[%c0_43, %c0_44] : memref<48x1xf32, #tpu.memory_space<vmem>>, vector<48x1xf32>
    %79 = vector.broadcast %78 : vector<48x1xf32> to vector<48x64xf32>
    %80 = arith.addf %77, %79 : vector<48x64xf32>
    %c0_45 = arith.constant 0 : index
    %c0_46 = arith.constant 0 : index
    %81 = vector.load %arg8[%c0_45, %c0_46] : memref<192x48xf32, #tpu.memory_space<vmem>>, vector<192x48xf32>
    %cst_47 = arith.constant dense<0.000000e+00> : vector<192x64xf32>
    %82 = tpu.matmul %81, %80, %cst_47 {dimension_numbers = #tpu.dot_dimension_numbers<[1], [0], [0], [1], [0, 0, 1, 1], [], []>} : vector<192x48xf32>, vector<48x64xf32>, vector<192x64xf32> -> vector<192x64xf32>
    %c0_48 = arith.constant 0 : index
    %c0_49 = arith.constant 0 : index
    %83 = vector.load %arg9[%c0_48, %c0_49] : memref<192x1xf32, #tpu.memory_space<vmem>>, vector<192x1xf32>
    %84 = vector.broadcast %83 : vector<192x1xf32> to vector<192x64xf32>
    %85 = arith.addf %82, %84 : vector<192x64xf32>
    %cst_50 = arith.constant 0.000000e+00 : f32
    %86 = vector.broadcast %cst_50 : f32 to vector<192x64xf32>
    %87 = arith.maximumf %85, %86 : vector<192x64xf32>
    %c0_51 = arith.constant 0 : index
    %c0_52 = arith.constant 0 : index
    %88 = vector.load %arg11[%c0_51, %c0_52] : memref<192x64xf32, #tpu.memory_space<vmem>>, vector<192x64xf32>
    tpu.vector_store %arg11[%c0_51, %c0_52], %87 {strides = array<i32>} : memref<192x64xf32, #tpu.memory_space<vmem>>, vector<192x64xf32>,
    return
  }
  func.func @transform_0(%arg0: i32) -> (i32, i32) {
    %c0_i32 = arith.constant 0 : i32
    %c0_i32_0 = arith.constant 0 : i32
    return %arg0, %c0_i32 : i32, i32
  }
  func.func @transform_1(%arg0: i32) -> (i32, i32) {
    %c0_i32 = arith.constant 0 : i32
    %c0_i32_0 = arith.constant 0 : i32
    %c0_i32_1 = arith.constant 0 : i32
    return %c0_i32, %c0_i32_0 : i32, i32
  }
  func.func @transform_2(%arg0: i32) -> (i32, i32, i32) {
    %c0_i32 = arith.constant 0 : i32
    %c0_i32_0 = arith.constant 0 : i32
    %c0_i32_1 = arith.constant 0 : i32
    %c0_i32_2 = arith.constant 0 : i32
    return %c0_i32, %c0_i32_0, %c0_i32_1 : i32, i32, i32
  }
  func.func @transform_3(%arg0: i32) -> (i32, i32) {
    %c0_i32 = arith.constant 0 : i32
    %c0_i32_0 = arith.constant 0 : i32
    %c0_i32_1 = arith.constant 0 : i32
    return %c0_i32, %c0_i32_0 : i32, i32
  }
  func.func @transform_4(%arg0: i32) -> (i32, i32) {
    %c0_i32 = arith.constant 0 : i32
    %c0_i32_0 = arith.constant 0 : i32
    %c0_i32_1 = arith.constant 0 : i32
    return %c0_i32, %c0_i32_0 : i32, i32
  }
  func.func @transform_5(%arg0: i32) -> (i32, i32) {
    %c0_i32 = arith.constant 0 : i32
    %c0_i32_0 = arith.constant 0 : i32
    %c0_i32_1 = arith.constant 0 : i32
    return %c0_i32, %c0_i32_0 : i32, i32
  }
  func.func @transform_6(%arg0: i32) -> (i32, i32) {
    %c0_i32 = arith.constant 0 : i32
    %c0_i32_0 = arith.constant 0 : i32
    %c0_i32_1 = arith.constant 0 : i32
    return %c0_i32, %c0_i32_0 : i32, i32
  }
  func.func @transform_7(%arg0: i32) -> (i32, i32) {
    %c0_i32 = arith.constant 0 : i32
    %c0_i32_0 = arith.constant 0 : i32
    %c0_i32_1 = arith.constant 0 : i32
    return %c0_i32, %c0_i32_0 : i32, i32
  }
  func.func @transform_8(%arg0: i32) -> (i32, i32) {
    %c0_i32 = arith.constant 0 : i32
    %c0_i32_0 = arith.constant 0 : i32
    %c0_i32_1 = arith.constant 0 : i32
    return %c0_i32, %c0_i32_0 : i32, i32
  }
  func.func @transform_9(%arg0: i32) -> (i32, i32) {
    %c0_i32 = arith.constant 0 : i32
    %c0_i32_0 = arith.constant 0 : i32
    return %arg0, %c0_i32 : i32, i32
  }
  func.func @transform_10(%arg0: i32) -> (i32, i32) {
    %c0_i32 = arith.constant 0 : i32
    %c0_i32_0 = arith.constant 0 : i32
    return %arg0, %c0_i32 : i32, i32
  }
}

</mosaic_0001>

<bundles_post_ra>
// kernel: shufflenet_unit_b_forward.1
= control target key start
LH: loop header
LB: loop body
LE: loop exit
PB: predicated region body
PF: predicated region fallthrough
CT: control target
= control target key end

     0   :  { %s3826_s13 = smov 0   ;;  %s5766_s0 = inlined_call_operand.vmem [shape: f32[96,256], index: 0, kind: input, shape index: {}]   ;;  %s5767_s1 = inlined_call_operand.vmem [shape: f32[256,64], index: 1, kind: input, shape index: {}]   ;;  %s5768_s2 = inlined_call_operand.vmem [shape: f32[9,256,64], index: 2, kind: input, shape index: {}]   ;;  %s5769_s3 = inlined_call_operand.vmem [shape: f32[48,48], index: 3, kind: input, shape index: {}]   ;;  %s5770_s4 = inlined_call_operand.vmem [shape: f32[48,1], index: 4, kind: input, shape index: {}]   ;;  %s5771_s5 = inlined_call_operand.vmem [shape: f32[48,9], index: 5, kind: input, shape index: {}]   ;;  %s5772_s6 = inlined_call_operand.vmem [shape: f32[48,1], index: 6, kind: input, shape index: {}]   ;;  %s5773_s7 = inlined_call_operand.vmem [shape: f32[192,48], index: 7, kind: input, shape index: {}]   ;;  %s5774_s8 = inlined_call_operand.vmem [shape: f32[192,1], index: 8, kind: input, shape index: {}]   ;;  %s5775_s9 = inlined_call_operand.vmem [shape: f32[96,64], index: 9, kind: output, shape index: {0}]   ;;  %s5776_s10 = inlined_call_operand.vmem [shape: f32[384,64], index: 10, kind: output, shape index: {1}]  }
   0x1 LB: > { %s2798_s14 = sadd.s32 4294967295, %s3759_s13   ;;  %p2802_p0 = scmp.ge.s32.totalorder %s3759_s13, 1  ;;  %s3759_s13 = sphi %s3826_s13, %s21_s13  }
   0x2   : > { %p317_p1 = scmp.lt.s32.totalorder %s3759_s13, 3 }
   0x4   : > { %p318_p2 = pnand %p2802_p0, %p317_p1 }
   0x6   : > { %321 = sbr.rel (%p318_p2) target bundleno = 862 (0x35e), region = 56 }
   0xb   : > { %s361_s15 = smul.u32 6, %s2798_s14  ;;  %v3761_v0 = vmov 0.0   ;;  %v3762_v1 = vmov 0   ;;  %v538_v2 = vld [vmem:[%s5770_s4] sm:$0xff]  ;;  %v539_v3 = vld [vmem:[%s5770_s4 + $0x8] sm:$0xff]  ;;  %v540_v4 = vld [vmem:[%s5770_s4 + $0x10] sm:$0xff] }
   0xc   : > { %657 = vmatprep.mubr.f32.mxu1 %v3761_v0  ;;  %3704 = vset.pattern.permute.xlu0 %v3762_v1  ;;  %v541_v5 = vld [vmem:[%s5770_s4 + $0x18] sm:$0xff]  ;;  %v542_v8 = vld [vmem:[%s5770_s4 + $0x20] sm:$0xff]  ;;  %v422_v9 = vld [vmem:[%s5767_s1 + $0xf0] sm:$0xff]  ;;  %vm574_vm0 = vcmask 392192   ;;  %vm525_vm1 = vcmask 523264   ;;  %s374_s24 = smul.u32 24, %s2798_s14 }
   0xd   : > { %p362_p3 = scmp.lt.s32.totalorder %s361_s15, 11  ;;  %3705 = vset.pattern.permute.xlu1 %v3762_v1  ;;  %546 = vperm.xlu0 %3704, %v538_v2   ;;  %v423_v6 = vld [vmem:[%s5767_s1 + $0xf8] sm:$0xff]  ;;  %v406_v14 = vld [vmem:[%s5767_s1 + $0x70] sm:$0xff]  ;;  %v543_v16 = vld [vmem:[%s5770_s4 + $0x28] sm:$0xff] }
   0xe   : > { %556 = vperm.xlu1 %3705, %v540_v4   ;;  %v407_v7 = vld [vmem:[%s5767_s1 + $0x78] sm:$0xff]  ;;  %3096 = vmatprep.subr.mxu0 %v423_v6  ;;  %v421_v18 = vld [vmem:[%s5767_s1 + $0xe8] sm:$0xff]  ;;  %v3908_v20 = vld [vmem:[%s5771_s5] sm:$0xff]  ;;  %p375_p4 = scmp.lt.s32.totalorder %s374_s24, 47 }
   0xf   : > { %s5842_s15 = smov (!%p362_p3, %s361_s15), 11  ;;  %3097 = vmatpush3.msra.mxu0 %v407_v7  ;;  %v405_v22 = vld [vmem:[%s5767_s1 + $0x68] sm:$0xff]  ;;  %v420_v26 = vld [vmem:[%s5767_s1 + $0xe0] sm:$0xff]  ;;  %v3939_v28 = vld [vmem:[%s5771_s5 + $0x10] sm:$0xff] }
  0x10   : > { %s3095_s22 = sshll.u32 %s5842_s15, 4  ;;  %3098 = vmatprep.subr.mxu0 %v422_v9  ;;  %v3924_v24 = vld [vmem:[%s5771_s5 + $0x8] sm:$0xff]  ;;  %v404_v30 = vld [vmem:[%s5767_s1 + $0x60] sm:$0xff]  ;;  %v3956_v32 = vld [vmem:[%s5771_s5 + $0x18] sm:$0xff]  ;;  %s2805_s17 = sshll.u32 %s5842_s15, 3 }
  0x11   : > { %s3863_s11 = scalar_lea.vmem %s5766_s0, %s3095_s22  ;;  %551 = vperm.xlu0 %3704, %v539_v3   ;;  %3099 = vmatpush3.msra.mxu0 %v406_v14  ;;  %v532_v31 = vld [vmem:[%s5769_s3] sm:$0xff]  ;;  %v419_v33 = vld [vmem:[%s5767_s1 + $0xd8] sm:$0xff]  ;;  %v3966_v34 = vld [vmem:[%s5771_s5 + $0x28] sm:$0xff]  ;;  %s4774_s30 = scalar_lea.vmem %s5775_s9, %s2805_s17 }
  0x12   : > { %v3872_v10 = vld [vmem:[%s3863_s11 + $0x58] sm:$0xff]  ;;  %v3875_v11 = vld [vmem:[%s3863_s11 + $0x50] sm:$0xff]  ;;  %v3878_v12 = vld [vmem:[%s3863_s11 + $0x48] sm:$0xff]  ;;  %561 = vperm.xlu1 %3705, %v541_v5   ;;  %3100 = vmatprep.subr.mxu0 %v421_v18  ;;  %s5844_s24 = smov (!%p375_p4, %s374_s24), 47 }
  0x13   : > { %613 = vmatprep.subr.mxu1 %v3872_v10  ;;  %v3882_v13 = vld [vmem:[%s3863_s11 + $0x40] sm:$0xff]  ;;  %v3889_v15 = vld [vmem:[%s3863_s11 + $0x38] sm:$0xff]  ;;  %v3896_v17 = vld [vmem:[%s3863_s11 + $0x30] sm:$0xff]  ;;  %3101 = vmatpush3.msra.mxu0 %v405_v22 }
  0x14   : > { %614 = vmatpush1.msra.mxu1 %v3875_v11  ;;  %v3903_v19 = vld [vmem:[%s3863_s11 + $0x28] sm:$0xff]  ;;  %v3912_v21 = vld [vmem:[%s3863_s11 + $0x20] sm:$0xff]  ;;  %v3919_v23 = vld [vmem:[%s3863_s11 + $0x18] sm:$0xff]  ;;  %3102 = vmatprep.subr.mxu0 %v420_v26 }
  0x15   : > { %615 = vmatprep.subr.mxu1 %v3878_v12  ;;  %566 = vperm.xlu0 %3704, %v542_v8   ;;  %v3928_v25 = vld [vmem:[%s3863_s11 + $0x10] sm:$0xff]  ;;  %v381_v27 = vld [vmem:[%s3863_s11 + $0x8] sm:$0xff]  ;;  %v3943_v29 = vld [vmem:[%s3863_s11] sm:$0xff]  ;;  %s2806_s11 = sshll.u32 %s5844_s24, 3 }
  0x16   : > { %616 = vmatpush1.msra.mxu1 %v3882_v13  ;;  %571 = vperm.xlu1 %3705, %v543_v16   ;;  %v403_v35 = vld [vmem:[%s5767_s1 + $0x58] sm:$0xff]  ;;  %v418_v36 = vld [vmem:[%s5767_s1 + $0xd0] sm:$0xff]  ;;  %v533_v37 = vld [vmem:[%s5769_s3 + $0x8] sm:$0xff]  ;;  %s5702_s26 = scalar_lea.vmem %s5776_s10, %s2806_s11 }
  0x17   : > { %617 = vmatprep.subr.mxu1 %v3889_v15  ;;  %3103 = vmatpush3.msra.mxu0 %v404_v30  ;;  %v402_v38 = vld [vmem:[%s5767_s1 + $0x50] sm:$0xff]  ;;  %v417_v39 = vld [vmem:[%s5767_s1 + $0xc8] sm:$0xff]  ;;  %v3990_v40 = vld [vmem:[%s5771_s5 + $0x20] sm:$0xff] }
  0x18   : > { %618 = vmatpush1.msra.mxu1 %v3896_v17  ;;  %3104 = vmatprep.subr.mxu0 %v419_v33  ;;  %v401_v41 = vld [vmem:[%s5767_s1 + $0x48] sm:$0xff]  ;;  %v416_v42 = vld [vmem:[%s5767_s1 + $0xc0] sm:$0xff]  ;;  %v743_v43 = vld [vmem:[%s5768_s2 + $0xf8] sm:$0xff] }
  0x19   : > { %619 = vmatprep.subr.mxu1 %v3903_v19  ;;  %841 = vperm.xlu0 %3704, %v3908_v20   ;;  %v534_v44 = vld [vmem:[%s5769_s3 + $0x10] sm:$0xff]  ;;  %v400_v45 = vld [vmem:[%s5767_s1 + $0x40] sm:$0xff]  ;;  %v415_v46 = vld [vmem:[%s5767_s1 + $0xb8] sm:$0xff] }
  0x1a   : > { %620 = vmatpush1.msra.mxu1 %v3912_v21  ;;  %846 = vperm.xlu1 %3705, %v3924_v24   ;;  %v399_v47 = vld [vmem:[%s5767_s1 + $0x38] sm:$0xff]  ;;  %v414_v49 = vld [vmem:[%s5767_s1 + $0xb0] sm:$0xff]  ;;  %v413_v53 = vld [vmem:[%s5767_s1 + $0xa8] sm:$0xff] }
  0x1b   : > { %621 = vmatprep.subr.mxu1 %v3919_v23  ;;  %3105 = vmatpush3.msra.mxu0 %v403_v35  ;;  %v727_v48 = vld [vmem:[%s5768_s2 + $0x78] sm:$0xff]  ;;  %v742_v50 = vld [vmem:[%s5768_s2 + $0xf0] sm:$0xff]  ;;  %v397_v54 = vld [vmem:[%s5767_s1 + $0x28] sm:$0xff] }
  0x1c   : > { %622 = vmatpush1.msra.mxu1 %v3928_v25  ;;  %3106 = vmatprep.subr.mxu0 %v418_v36  ;;  %v535_v51 = vld [vmem:[%s5769_s3 + $0x18] sm:$0xff]  ;;  %v398_v52 = vld [vmem:[%s5767_s1 + $0x30] sm:$0xff]  ;;  %v412_v56 = vld [vmem:[%s5767_s1 + $0xa0] sm:$0xff] }
  0x1d   : > { %623 = vmatprep.subr.mxu1 %v381_v27  ;;  %851 = vperm.xlu0 %3704, %v3939_v28   ;;  %v726_v55 = vld [vmem:[%s5768_s2 + $0x70] sm:$0xff]  ;;  %v741_v57 = vld [vmem:[%s5768_s2 + $0xe8] sm:$0xff]  ;;  %v536_v58 = vld [vmem:[%s5769_s3 + $0x20] sm:$0xff] }
  0x1e   : > { %624 = vmatpush1.msra.mxu1 %v3943_v29  ;;  %856 = vperm.xlu1 %3705, %v3956_v32   ;;  %v396_v59 = vld [vmem:[%s5767_s1 + $0x20] sm:$0xff]  ;;  %v411_v60 = vld [vmem:[%s5767_s1 + $0x98] sm:$0xff]  ;;  %v725_v62 = vld [vmem:[%s5768_s2 + $0x68] sm:$0xff] }
  0x1f   : > { %2807 = vmatmul.mubr.msk.f32.vlgmr.msra.gmra.mxu1 %vm574_vm0, %v532_v31  ;;  %488 = vmatprep.mubr.f32.mxu0 %v381_v27  ;;  %v395_v61 = vld [vmem:[%s5767_s1 + $0x18] sm:$0xff]  ;;  %v410_v63 = vld [vmem:[%s5767_s1 + $0x90] sm:$0xff]  ;;  %v740_v2 = vld [vmem:[%s5768_s2 + $0xe0] sm:$0xff] }
  0x20   : > { %663 = vmatprep.mubr.f32.mxu1 %v3761_v0  ;;  %3107 = vmatpush3.msra.mxu0 %v402_v38  ;;  %v537_v3 = vld [vmem:[%s5769_s3 + $0x28] sm:$0xff]  ;;  %v394_v4 = vld [vmem:[%s5767_s1 + $0x10] sm:$0xff]  ;;  %v724_v6 = vld [vmem:[%s5768_s2 + $0x60] sm:$0xff] }
  0x21   : > { %866 = vperm.xlu0 %3704, %v3966_v34   ;;  %3108 = vmatprep.subr.mxu0 %v417_v39  ;;  %v409_v5 = vld [vmem:[%s5767_s1 + $0x88] sm:$0xff]  ;;  %v739_v7 = vld [vmem:[%s5768_s2 + $0xd8] sm:$0xff]  ;;  %v408_v8 = vld [vmem:[%s5767_s1 + $0x80] sm:$0xff] }
  0x22   : > { %3109 = vmatpush3.msra.mxu0 %v401_v41  ;;  %3146 = vmatprep.subr.mxu1 %v743_v43  ;;  %v723_v9 = vld [vmem:[%s5768_s2 + $0x58] sm:$0xff]  ;;  %v392_v14 = vld [vmem:[%s5767_s1] sm:$0xff]  ;;  %v738_v16 = vld [vmem:[%s5768_s2 + $0xd0] sm:$0xff] }
  0x23   : > { %2808 = vmatmul.mubr.msk.f32.gmra.mxu1 %vm574_vm0, %v533_v37  ;;  %3110 = vmatprep.subr.mxu0 %v416_v42  ;;  %v2844_v18 = vld [vmem:[%s5768_s2 + $0x1f8] sm:$0xff]  ;;  %v722_v26 = vld [vmem:[%s5768_s2 + $0x50] sm:$0xff]  ;;  %v737_v31 = vld [vmem:[%s5768_s2 + $0xc8] sm:$0xff] }
  0x24   : > { %669 = vmatprep.mubr.f32.mxu1 %v3761_v0  ;;  %3111 = vmatpush3.msra.mxu0 %v400_v45  ;;  %v2828_v22 = vld [vmem:[%s5768_s2 + $0x178] sm:$0xff]  ;;  %v2843_v27 = vld [vmem:[%s5768_s2 + $0x1f0] sm:$0xff]  ;;  %v2842_v33 = vld [vmem:[%s5768_s2 + $0x1e8] sm:$0xff] }
  0x25   : > { %861 = vperm.xlu0 %3704, %v3990_v40   ;;  %3112 = vmatprep.subr.mxu0 %v415_v46  ;;  %v2827_v30 = vld [vmem:[%s5768_s2 + $0x170] sm:$0xff]  ;;  %v2826_v35 = vld [vmem:[%s5768_s2 + $0x168] sm:$0xff]  ;;  %v2841_v36 = vld [vmem:[%s5768_s2 + $0x1e0] sm:$0xff] }
  0x26   : > { %3113 = vmatpush3.msra.mxu0 %v399_v47  ;;  %3147 = vmatpush3.msra.mxu1 %v727_v48  ;;  %v736_v37 = vld [vmem:[%s5768_s2 + $0xc0] sm:$0xff]  ;;  %v2840_v39 = vld [vmem:[%s5768_s2 + $0x1d8] sm:$0xff]  ;;  %v2839_v42 = vld [vmem:[%s5768_s2 + $0x1d0] sm:$0xff] }
  0x27   : > { %2809 = vmatmul.mubr.msk.f32.gmra.mxu1 %vm574_vm0, %v534_v44  ;;  %3114 = vmatprep.subr.mxu0 %v414_v49  ;;  %v2825_v38 = vld [vmem:[%s5768_s2 + $0x160] sm:$0xff]  ;;  %v2824_v41 = vld [vmem:[%s5768_s2 + $0x158] sm:$0xff]  ;;  %v2823_v43 = vld [vmem:[%s5768_s2 + $0x150] sm:$0xff] }
  0x28   : > { %675 = vmatprep.mubr.f32.mxu1 %v3761_v0  ;;  %3148 = vmatprep.subr.mxu1 %v742_v50  ;;  %v719_v44 = vld [vmem:[%s5768_s2 + $0x38] sm:$0xff]  ;;  %v2838_v45 = vld [vmem:[%s5768_s2 + $0x1c8] sm:$0xff]  ;;  %v734_v46 = vld [vmem:[%s5768_s2 + $0xb0] sm:$0xff] }
  0x29   : > { %3115 = vmatpush3.msra.mxu0 %v398_v52  ;;  %3149 = vmatpush3.msra.mxu1 %v726_v55  ;;  %v2822_v47 = vld [vmem:[%s5768_s2 + $0x148] sm:$0xff]  ;;  %v2837_v48 = vld [vmem:[%s5768_s2 + $0x1c0] sm:$0xff]  ;;  %v2836_v50 = vld [vmem:[%s5768_s2 + $0x1b8] sm:$0xff] }
  0x2a   : > { %3116 = vmatprep.subr.mxu0 %v413_v53  ;;  %3150 = vmatprep.subr.mxu1 %v741_v57  ;;  %v2821_v49 = vld [vmem:[%s5768_s2 + $0x140] sm:$0xff]  ;;  %v717_v52 = vld [vmem:[%s5768_s2 + $0x28] sm:$0xff]  ;;  %v2835_v53 = vld [vmem:[%s5768_s2 + $0x1b0] sm:$0xff] }
  0x2b   : > { %2810 = vmatmul.mubr.msk.f32.gmra.mxu1 %vm574_vm0, %v535_v51  ;;  %3117 = vmatpush3.msra.mxu0 %v397_v54  ;;  %v2820_v51 = vld [vmem:[%s5768_s2 + $0x138] sm:$0xff]  ;;  %v732_v54 = vld [vmem:[%s5768_s2 + $0xa0] sm:$0xff]  ;;  %v2819_v55 = vld [vmem:[%s5768_s2 + $0x130] sm:$0xff] }
  0x2c   : > { %681 = vmatprep.mubr.f32.mxu1 %v3761_v0  ;;  %3118 = vmatprep.subr.mxu0 %v412_v56  ;;  %v2834_v56 = vld [vmem:[%s5768_s2 + $0x1a8] sm:$0xff] }
  0x2d   : > { %3119 = vmatpush3.msra.mxu0 %v396_v59  ;;  %3151 = vmatpush3.msra.mxu1 %v725_v62  ;;  %v2818_v57 = vld [vmem:[%s5768_s2 + $0x128] sm:$0xff]  ;;  %v2817_v59 = vld [vmem:[%s5768_s2 + $0x120] sm:$0xff]  ;;  %v2815_v62 = vld [vmem:[%s5768_s2 + $0x110] sm:$0xff] }
  0x2e   : > { %3120 = vmatprep.subr.mxu0 %v411_v60  ;;  %3152 = vmatprep.subr.mxu1 %v740_v2  ;;  %v2832_v60 = vld [vmem:[%s5768_s2 + $0x198] sm:$0xff]  ;;  %v2830_v2 = vld [vmem:[%s5768_s2 + $0x188] sm:$0xff] }
  0x2f   : > { %2811 = vmatmul.mubr.msk.f32.gmra.mxu1 %vm574_vm0, %v536_v58  ;;  %3121 = vmatpush3.msra.mxu0 %v395_v61  ;;  %v2833_v58 = vld [vmem:[%s5768_s2 + $0x1a0] sm:$0xff]  ;;  %v715_v61 = vld [vmem:[%s5768_s2 + $0x18] sm:$0xff] }
  0x30   : > { %687 = vmatprep.mubr.f32.mxu1 %v3761_v0  ;;  %3122 = vmatprep.subr.mxu0 %v410_v63  ;;  %v393_v0 = vld [vmem:[%s5767_s1 + $0x8] sm:$0xff] }
  0x31   : > { %3123 = vmatpush3.msra.mxu0 %v394_v4  ;;  %3153 = vmatpush3.msra.mxu1 %v724_v6  ;;  %v729_v63 = vld [vmem:[%s5768_s2 + $0x88] sm:$0xff]  ;;  %v2829_v6 = vld [vmem:[%s5768_s2 + $0x180] sm:$0xff] }
  0x32   : > { %3124 = vmatprep.subr.mxu0 %v409_v5  ;;  %3154 = vmatprep.subr.mxu1 %v739_v7  ;;  %v2814_v4 = vld [vmem:[%s5768_s2 + $0x108] sm:$0xff]  ;;  %v728_v5 = vld [vmem:[%s5768_s2 + $0x80] sm:$0xff] }
  0x33   : > { %2812 = vmatmul.mubr.msk.f32.gmra.mxu1 %vm574_vm0, %v537_v3  ;;  %3125 = vmatpush3.msra.mxu0 %v393_v0  ;;  %v713_v3 = vld [vmem:[%s5768_s2 + $0x8] sm:$0xff]  ;;  %v712_v0 = vld [vmem:[%s5768_s2] sm:$0xff] }
  0x34   : > { %3126 = vmatprep.subr.mxu0 %v408_v8  ;;  %3155 = vmatpush3.msra.mxu1 %v723_v9  ;;  %v2813_v7 = vld [vmem:[%s5768_s2 + $0x100] sm:$0xff]  ;;  %v2876_v8 = vld [vmem:[%s5768_s2 + $0x2f8] sm:$0xff] }
  0x35   : > { %3127 = vmatpush3.msra.mxu0 %v392_v14  ;;  %3156 = vmatprep.subr.mxu1 %v738_v16  ;;  %v2908_v9 = vld [vmem:[%s5768_s2 + $0x3f8] sm:$0xff]  ;;  %v3763_v14 = vmov 1   ;;  %v3764_v16 = vmov 2  }
  0x36   : > { %3196 = vmatprep.subr.mxu0 %v2844_v18  ;;  %489 = vmatmul.mubr.f32.vlgmr.msra.gmra.mxu0 %v3943_v29  ;;  %v721_v29 = vld [vmem:[%s5768_s2 + $0x48] sm:$0xff]  ;;  %v3765_v18 = vmov 4  }
  0x37   : > { %3197 = vmatpush3.msra.mxu0 %v2828_v22  ;;  %3157 = vmatpush3.msra.mxu1 %v722_v26  ;;  %v3766_v22 = vmov 3   ;;  %v3767_v26 = vmov 5  }
  0x38   : > { %3198 = vmatprep.subr.mxu0 %v2843_v27  ;;  %493 = vmatprep.mubr.f32.mxu0 %v3919_v23  ;;  %v720_v23 = vld [vmem:[%s5768_s2 + $0x40] sm:$0xff]  ;;  %v3768_v27 = vmov 6  }
  0x39   : > { %3199 = vmatpush3.msra.mxu0 %v2827_v30  ;;  %3158 = vmatprep.subr.mxu1 %v737_v31 }
  0x3a   : > { %3200 = vmatprep.subr.mxu0 %v2842_v33  ;;  %494 = vmatmul.mubr.f32.gmra.mxu0 %v3928_v25  ;;  %v735_v25 = vld [vmem:[%s5768_s2 + $0xb8] sm:$0xff] }
  0x3b   : > { %3201 = vmatpush3.msra.mxu0 %v2826_v35  ;;  %3159 = vmatpush3.msra.mxu1 %v721_v29 }
  0x3c   : > { %3202 = vmatprep.subr.mxu0 %v2841_v36  ;;  %3160 = vmatprep.subr.mxu1 %v736_v37  ;;  %v2892_v37 = vld [vmem:[%s5768_s2 + $0x378] sm:$0xff] }
  0x3d   : > { %3203 = vmatpush3.msra.mxu0 %v2825_v38  ;;  %3161 = vmatpush3.msra.mxu1 %v720_v23  ;;  %v2907_v23 = vld [vmem:[%s5768_s2 + $0x3f0] sm:$0xff] }
  0x3e   : > { %3204 = vmatprep.subr.mxu0 %v2840_v39  ;;  %498 = vmatprep.mubr.f32.mxu0 %v3903_v19  ;;  %v718_v19 = vld [vmem:[%s5768_s2 + $0x30] sm:$0xff] }
  0x3f   : > { %3205 = vmatpush3.msra.mxu0 %v2824_v41  ;;  %3162 = vmatprep.subr.mxu1 %v735_v25  ;;  %v2859_v25 = vld [vmem:[%s5768_s2 + $0x270] sm:$0xff] }
  0x40   : > { %3206 = vmatprep.subr.mxu0 %v2839_v42  ;;  %499 = vmatmul.mubr.f32.gmra.mxu0 %v3912_v21  ;;  %v733_v21 = vld [vmem:[%s5768_s2 + $0xa8] sm:$0xff]  ;;  %v2891_v42 = vld [vmem:[%s5768_s2 + $0x370] sm:$0xff] }
  0x41   : > { %3207 = vmatpush3.msra.mxu0 %v2823_v43  ;;  %3163 = vmatpush3.msra.mxu1 %v719_v44 }
  0x42   : > { %3208 = vmatprep.subr.mxu0 %v2838_v45  ;;  %3164 = vmatprep.subr.mxu1 %v734_v46  ;;  %v2874_v46 = vld [vmem:[%s5768_s2 + $0x2e8] sm:$0xff] }
  0x43   : > { %3209 = vmatpush3.msra.mxu0 %v2822_v47  ;;  %3165 = vmatpush3.msra.mxu1 %v718_v19  ;;  %v2906_v47 = vld [vmem:[%s5768_s2 + $0x3e8] sm:$0xff] }
  0x44   : > { %3210 = vmatprep.subr.mxu0 %v2837_v48  ;;  %503 = vmatprep.mubr.f32.mxu0 %v3889_v15  ;;  %v716_v15 = vld [vmem:[%s5768_s2 + $0x20] sm:$0xff] }
  0x45   : > { %3211 = vmatpush3.msra.mxu0 %v2821_v49  ;;  %3166 = vmatprep.subr.mxu1 %v733_v21 }
  0x46   : > { %3212 = vmatprep.subr.mxu0 %v2836_v50  ;;  %504 = vmatmul.mubr.f32.gmra.mxu0 %v3896_v17  ;;  %v731_v17 = vld [vmem:[%s5768_s2 + $0x98] sm:$0xff]  ;;  %v2858_v50 = vld [vmem:[%s5768_s2 + $0x268] sm:$0xff] }
  0x47   : > { %3213 = vmatpush3.msra.mxu0 %v2820_v51  ;;  %3167 = vmatpush3.msra.mxu1 %v717_v52  ;;  %v2890_v51 = vld [vmem:[%s5768_s2 + $0x368] sm:$0xff]  ;;  %v2873_v52 = vld [vmem:[%s5768_s2 + $0x2e0] sm:$0xff] }
  0x48   : > { %3214 = vmatprep.subr.mxu0 %v2835_v53  ;;  %3168 = vmatprep.subr.mxu1 %v732_v54  ;;  %v2905_v53 = vld [vmem:[%s5768_s2 + $0x3e0] sm:$0xff] }
  0x49   : > { %3215 = vmatpush3.msra.mxu0 %v2819_v55  ;;  %3169 = vmatpush3.msra.mxu1 %v716_v15  ;;  %v2857_v15 = vld [vmem:[%s5768_s2 + $0x260] sm:$0xff] }
  0x4a   : > { %3216 = vmatprep.subr.mxu0 %v2834_v56  ;;  %508 = vmatprep.mubr.f32.mxu0 %v3878_v12  ;;  %v2816_v12 = vld [vmem:[%s5768_s2 + $0x118] sm:$0xff]  ;;  %v2889_v56 = vld [vmem:[%s5768_s2 + $0x360] sm:$0xff] }
  0x4b   : > { %3217 = vmatpush3.msra.mxu0 %v2818_v57  ;;  %3170 = vmatprep.subr.mxu1 %v731_v17 }
  0x4c   : > { %3218 = vmatprep.subr.mxu0 %v2833_v58  ;;  %509 = vmatmul.mubr.f32.gmra.mxu0 %v3882_v13  ;;  %v730_v13 = vld [vmem:[%s5768_s2 + $0x90] sm:$0xff] }
  0x4d   : > { %3219 = vmatpush3.msra.mxu0 %v2817_v59  ;;  %513 = vmatprep.mubr.f32.mxu0 %v3872_v10  ;;  %v2831_v10 = vld [vmem:[%s5768_s2 + $0x190] sm:$0xff]  ;;  %v2872_v59 = vld [vmem:[%s5768_s2 + $0x2d8] sm:$0xff] }
  0x4e   : > { %3220 = vmatprep.subr.mxu0 %v2832_v60  ;;  %3171 = vmatpush3.msra.mxu1 %v715_v61  ;;  %v2904_v60 = vld [vmem:[%s5768_s2 + $0x3d8] sm:$0xff] }
  0x4f   : > { %3221 = vmatpush3.msra.mxu0 %v2816_v12  ;;  %3172 = vmatprep.subr.mxu1 %v730_v13  ;;  %v2856_v13 = vld [vmem:[%s5768_s2 + $0x258] sm:$0xff] }
  0x50   : > { %514 = vmatmul.mubr.f32.gmra.mxu0 %v3875_v11  ;;  %3222 = vmatprep.subr.mxu0 %v2831_v10  ;;  %v714_v11 = vld [vmem:[%s5768_s2 + $0x10] sm:$0xff]  ;;  %v2888_v10 = vld [vmem:[%s5768_s2 + $0x358] sm:$0xff] }
  0x51   : > { %3173 = vmatpush3.msra.mxu1 %v714_v11  ;;  %3223 = vmatpush3.msra.mxu0 %v2815_v62  ;;  %v2871_v62 = vld [vmem:[%s5768_s2 + $0x2d0] sm:$0xff] }
  0x52   : > { %3174 = vmatprep.subr.mxu1 %v729_v63  ;;  %3224 = vmatprep.subr.mxu0 %v2830_v2  ;;  %v2903_v63 = vld [vmem:[%s5768_s2 + $0x3d0] sm:$0xff] }
  0x53   : > { %3175 = vmatpush3.msra.mxu1 %v713_v3  ;;  %3225 = vmatpush3.msra.mxu0 %v2814_v4  ;;  %v2855_v3 = vld [vmem:[%s5768_s2 + $0x250] sm:$0xff] }
  0x54   : > { %3176 = vmatprep.subr.mxu1 %v728_v5  ;;  %3226 = vmatprep.subr.mxu0 %v2829_v6  ;;  %v2887_v4 = vld [vmem:[%s5768_s2 + $0x350] sm:$0xff] }
  0x55   : > { %3177 = vmatpush3.msra.mxu1 %v712_v0  ;;  %3227 = vmatpush3.msra.mxu0 %v2813_v7 }
  0x56   : > { %3246 = vmatprep.subr.mxu1 %v2876_v8  ;;  %3296 = vmatprep.subr.mxu0 %v2908_v9  ;;  %v2870_v8 = vld [vmem:[%s5768_s2 + $0x2c8] sm:$0xff] }
  0x57   : > { %3706 = vset.pattern.permute.xlu1 %v3763_v14  ;;  %3711 = vset.pattern.permute.xlu0 %v3763_v14  ;;  %v2902_v9 = vld [vmem:[%s5768_s2 + $0x3c8] sm:$0xff] }
  0x58   : > { %1030 = vperm.xlu1 %3706, %v3966_v34   ;;  %1014 = vperm.xlu0 %3711, %v3924_v24  }
  0x5c   : > { %1026 = vperm.xlu1 %3706, %v3990_v40   ;;  %3712 = vset.pattern.permute.xlu0 %v3764_v16 }
  0x5d   : > { %1194 = vperm.xlu0 %3712, %v3966_v34  }
  0x60   : > { %1022 = vperm.xlu1 %3706, %v3956_v32  }
  0x61   : > { %1178 = vperm.xlu0 %3712, %v3924_v24  }
  0x64   : > { %3707 = vset.pattern.permute.xlu1 %v3764_v16 }
  0x65   : > { %1190 = vperm.xlu1 %3707, %v3990_v40   ;;  %3717 = vset.pattern.permute.xlu0 %v3766_v22 }
  0x66   : > { %1358 = vperm.xlu0 %3717, %v3966_v34  }
  0x69   : > { %3708 = vset.pattern.permute.xlu1 %v3763_v14 }
  0x6a   : > { %1018 = vperm.xlu1 %3708, %v3939_v28   ;;  %1354 = vperm.xlu0 %3717, %v3990_v40  }
  0x6e   : > { %3709 = vset.pattern.permute.xlu1 %v3764_v16  ;;  %1342 = vperm.xlu0 %3717, %v3924_v24  }
  0x6f   : > { %1186 = vperm.xlu1 %3709, %v3956_v32  }
  0x72   : > { %3722 = vset.pattern.permute.xlu0 %v3765_v18 }
  0x73   : > { %3710 = vset.pattern.permute.xlu1 %v3765_v18  ;;  %1518 = vperm.xlu0 %3722, %v3990_v40  }
  0x74   : > { %1522 = vperm.xlu1 %3710, %v3966_v34  }
  0x77   : > { %1506 = vperm.xlu0 %3722, %v3924_v24  }
  0x78   : > { %3713 = vset.pattern.permute.xlu1 %v3764_v16 }
  0x79   : > { %1182 = vperm.xlu1 %3713, %v3939_v28  }
  0x7b   : > { %3727 = vset.pattern.permute.xlu0 %v3767_v26 }
  0x7c   : > { %1682 = vperm.xlu0 %3727, %v3990_v40  }
  0x7d   : > { %3714 = vset.pattern.permute.xlu1 %v3766_v22 }
  0x7e   : > { %1350 = vperm.xlu1 %3714, %v3956_v32  }
  0x80   : > { %1670 = vperm.xlu0 %3727, %v3924_v24  }
  0x82   : > { %3715 = vset.pattern.permute.xlu1 %v3767_v26 }
  0x83   : > { %1686 = vperm.xlu1 %3715, %v3966_v34  }
  0x87   : > { %3716 = vset.pattern.permute.xlu1 %v3763_v14  ;;  %v2854_v14 = vld [vmem:[%s5768_s2 + $0x248] sm:$0xff] }
  0x88   : > { %1010 = vperm.xlu1 %3716, %v3908_v20   ;;  %v547_v30 = vpop.permute.xlu0 %546 }
  0x89   : > { %v557_v43 = vpop.permute.xlu1 %556 }
  0x8c   : > { %3718 = vset.pattern.permute.xlu1 %v3766_v22 }
  0x8d   : > { %1346 = vperm.xlu1 %3718, %v3939_v28   ;;  %v562_v57 = vpop.permute.xlu1 %561 }
  0x91   : > { %3719 = vset.pattern.permute.xlu1 %v3765_v18 }
  0x92   : > { %1514 = vperm.xlu1 %3719, %v3956_v32  }
  0x96   : > { %3720 = vset.pattern.permute.xlu1 %v3768_v27 }
  0x97   : > { %1850 = vperm.xlu1 %3720, %v3966_v34   ;;  %v552_v34 = vpop.permute.xlu0 %551 }
  0x9b   : > { %3721 = vset.pattern.permute.xlu1 %v3764_v16  ;;  %v567_v5 = vpop.permute.xlu0 %566  ;;  %v2886_v16 = vld [vmem:[%s5768_s2 + $0x348] sm:$0xff] }
  0x9c   : > { %1174 = vperm.xlu1 %3721, %v3908_v20  }
  0xa0   : > { %3723 = vset.pattern.permute.xlu1 %v3765_v18 }
  0xa1   : > { %1510 = vperm.xlu1 %3723, %v3939_v28   ;;  %v2860_v28 = vld [vmem:[%s5768_s2 + $0x278] sm:$0xff] }
  0xa5   : > { %3724 = vset.pattern.permute.xlu1 %v3767_v26 }
  0xa6   : > { %1678 = vperm.xlu1 %3724, %v3956_v32   ;;  %v2875_v32 = vld [vmem:[%s5768_s2 + $0x2f0] sm:$0xff] }
  0xdf   : > { %v659_v31 = vpop.f32.mrf.mxu1 }
  0xe0   : > { %v660_v40 = vadd.f32 %v659_v31, %v547_v30  ;;  %v2901_v31 = vld [vmem:[%s5768_s2 + $0x3c0] sm:$0xff] }
  0xe1   : > { %v661_v24 = vpop.f32.mrf.mxu1 }
  0xe2   : > { %v662_v33 = vadd.f32 %v661_v24, %v547_v30  ;;  %v4320_v36 = vmax.f32 %v660_v40, 0.0  ;;  %v2869_v30 = vld [vmem:[%s5768_s2 + $0x2c0] sm:$0xff] }
  0xe3   : > { %v665_v35 = vpop.f32.mrf.mxu1 }
  0xe4   : > { %v4318_v29 = vmax.f32 %v662_v33, 0.0  ;;  %v666_v39 = vadd.f32 %v665_v35, %v552_v34  ;;  %v2853_v35 = vld [vmem:[%s5768_s2 + $0x240] sm:$0xff] }
  0xe5   : > { %v667_v20 = vpop.f32.mrf.mxu1 }
  0xe6   : > { %v668_v38 = vadd.f32 %v667_v20, %v552_v34  ;;  %808 = vmatprep.mubr.f32.mxu1 %v4318_v29  ;;  %978 = vmatprep.mubr.f32.mxu0 %v4318_v29  ;;  %v4352_v48 = vmax.f32 %v666_v39, 0.0  ;;  %v2885_v34 = vld [vmem:[%s5768_s2 + $0x340] sm:$0xff]  ;;  %v572_v20 = vpop.permute.xlu1 %571  ;;  %v2884_v39 = vld [vmem:[%s5768_s2 + $0x338] sm:$0xff] }
  0xe7   : > { %v671_v41 = vpop.f32.mrf.mxu1  ;;  %809 = vmatmul.mubr.f32.vlgmr.msra.gmra.mxu1 %v4320_v36  ;;  %979 = vmatmul.mubr.f32.vlgmr.msra.gmra.mxu0 %v4320_v36 }
  0xe8   : > { %v4344_v44 = vmax.f32 %v668_v38, 0.0  ;;  %3247 = vmatpush3.msra.mxu1 %v2860_v28  ;;  %3297 = vmatpush3.msra.mxu0 %v2892_v37  ;;  %v672_v49 = vadd.f32 %v671_v41, %v557_v43  ;;  %v2868_v37 = vld [vmem:[%s5768_s2 + $0x2b8] sm:$0xff]  ;;  %v2867_v41 = vld [vmem:[%s5768_s2 + $0x2b0] sm:$0xff] }
  0xe9   : > { %3248 = vmatprep.subr.mxu1 %v2875_v32  ;;  %3298 = vmatprep.subr.mxu0 %v2907_v23  ;;  %v673_v45 = vpop.f32.mrf.mxu1  ;;  %v2900_v38 = vld [vmem:[%s5768_s2 + $0x3b8] sm:$0xff] }
  0xea   : > { %v674_v19 = vadd.f32 %v673_v45, %v557_v43  ;;  %3249 = vmatpush3.msra.mxu1 %v2859_v25  ;;  %3299 = vmatpush3.msra.mxu0 %v2891_v42  ;;  %v4378_v17 = vmax.f32 %v672_v49, 0.0  ;;  %v2852_v23 = vld [vmem:[%s5768_s2 + $0x238] sm:$0xff]  ;;  %v2899_v25 = vld [vmem:[%s5768_s2 + $0x3b0] sm:$0xff] }
  0xeb   : > { %813 = vmatprep.mubr.f32.mxu1 %v4344_v44  ;;  %983 = vmatprep.mubr.f32.mxu0 %v4344_v44  ;;  %v677_v21 = vpop.f32.mrf.mxu1  ;;  %v2851_v45 = vld [vmem:[%s5768_s2 + $0x230] sm:$0xff] }
  0xec   : > { %3250 = vmatprep.subr.mxu1 %v2874_v46  ;;  %3300 = vmatprep.subr.mxu0 %v2906_v47  ;;  %v4368_v54 = vmax.f32 %v674_v19, 0.0  ;;  %v678_v12 = vadd.f32 %v677_v21, %v562_v57  ;;  %v2883_v46 = vld [vmem:[%s5768_s2 + $0x330] sm:$0xff]  ;;  %v2866_v47 = vld [vmem:[%s5768_s2 + $0x2a8] sm:$0xff] }
  0xed   : > { %814 = vmatmul.mubr.f32.gmra.mxu1 %v4352_v48  ;;  %984 = vmatmul.mubr.f32.gmra.mxu0 %v4352_v48  ;;  %v679_v55 = vpop.f32.mrf.mxu1  ;;  %v2898_v19 = vld [vmem:[%s5768_s2 + $0x3a8] sm:$0xff] }
  0xee   : > { %3251 = vmatpush3.msra.mxu1 %v2858_v50  ;;  %3301 = vmatpush3.msra.mxu0 %v2890_v51  ;;  %v680_v58 = vadd.f32 %v679_v55, %v562_v57  ;;  %v4410_v0 = vmax.f32 %v678_v12, 0.0  ;;  %v2850_v21 = vld [vmem:[%s5768_s2 + $0x228] sm:$0xff]  ;;  %v2865_v51 = vld [vmem:[%s5768_s2 + $0x2a0] sm:$0xff]  ;;  %v2848_v57 = vld [vmem:[%s5768_s2 + $0x218] sm:$0xff] }
  0xef   : > { %3252 = vmatprep.subr.mxu1 %v2873_v52  ;;  %3302 = vmatprep.subr.mxu0 %v2905_v53  ;;  %v683_v61 = vpop.f32.mrf.mxu1  ;;  %v2882_v50 = vld [vmem:[%s5768_s2 + $0x328] sm:$0xff]  ;;  %v2897_v52 = vld [vmem:[%s5768_s2 + $0x3a0] sm:$0xff]  ;;  %v2879_v12 = vld [vmem:[%s5768_s2 + $0x310] sm:$0xff] }
  0xf0   : > { %3253 = vmatpush3.msra.mxu1 %v2857_v15  ;;  %3303 = vmatpush3.msra.mxu0 %v2889_v56  ;;  %v4400_v2 = vmax.f32 %v680_v58, 0.0  ;;  %v684_v24 = vadd.f32 %v683_v61, %v567_v5  ;;  %v2849_v53 = vld [vmem:[%s5768_s2 + $0x220] sm:$0xff]  ;;  %v2864_v15 = vld [vmem:[%s5768_s2 + $0x298] sm:$0xff]  ;;  %v2847_v61 = vld [vmem:[%s5768_s2 + $0x210] sm:$0xff] }
  0xf1   : > { %818 = vmatprep.mubr.f32.mxu1 %v4368_v54  ;;  %988 = vmatprep.mubr.f32.mxu0 %v4368_v54  ;;  %v685_v11 = vpop.f32.mrf.mxu1  ;;  %v2881_v55 = vld [vmem:[%s5768_s2 + $0x320] sm:$0xff]  ;;  %v2896_v56 = vld [vmem:[%s5768_s2 + $0x398] sm:$0xff] }
  0xf2   : > { %3254 = vmatprep.subr.mxu1 %v2872_v59  ;;  %3304 = vmatprep.subr.mxu0 %v2904_v60  ;;  %v686_v7 = vadd.f32 %v685_v11, %v567_v5  ;;  %v4448_v32 = vmax.f32 %v684_v24, 0.0  ;;  %v2880_v58 = vld [vmem:[%s5768_s2 + $0x318] sm:$0xff]  ;;  %v2863_v59 = vld [vmem:[%s5768_s2 + $0x290] sm:$0xff]  ;;  %v2846_v11 = vld [vmem:[%s5768_s2 + $0x208] sm:$0xff] }
  0xf3   : > { %819 = vmatmul.mubr.f32.gmra.mxu1 %v4378_v17  ;;  %989 = vmatmul.mubr.f32.gmra.mxu0 %v4378_v17  ;;  %v689_v6 = vpop.f32.mrf.mxu1  ;;  %v2895_v60 = vld [vmem:[%s5768_s2 + $0x390] sm:$0xff]  ;;  %v2877_v5 = vld [vmem:[%s5768_s2 + $0x300] sm:$0xff]  ;;  %v2970_v24 = vld [vmem:[%s5768_s2 + $0x5e8] sm:$0xff] }
  0xf4   : > { %3255 = vmatpush3.msra.mxu1 %v2856_v13  ;;  %3305 = vmatpush3.msra.mxu0 %v2888_v10  ;;  %v4432_v33 = vmax.f32 %v686_v7, 0.0  ;;  %v690_v42 = vadd.f32 %v689_v6, %v572_v20  ;;  %v2862_v13 = vld [vmem:[%s5768_s2 + $0x288] sm:$0xff]  ;;  %v2940_v6 = vld [vmem:[%s5768_s2 + $0x4f8] sm:$0xff] }
  0xf5   : > { %3256 = vmatprep.subr.mxu1 %v2871_v62  ;;  %3306 = vmatprep.subr.mxu0 %v2903_v63  ;;  %v691_v40 = vpop.f32.mrf.mxu1  ;;  %v2894_v10 = vld [vmem:[%s5768_s2 + $0x388] sm:$0xff]  ;;  %v2861_v63 = vld [vmem:[%s5768_s2 + $0x280] sm:$0xff]  ;;  %v2972_v7 = vld [vmem:[%s5768_s2 + $0x5f8] sm:$0xff] }
  0xf6   : > { %3257 = vmatpush3.msra.mxu1 %v2855_v3  ;;  %3307 = vmatpush3.msra.mxu0 %v2887_v4  ;;  %v692_v28 = vadd.f32 %v691_v40, %v572_v20  ;;  %v4480_v49 = vmax.f32 %v690_v42, 0.0  ;;  %v2878_v62 = vld [vmem:[%s5768_s2 + $0x308] sm:$0xff]  ;;  %v2893_v3 = vld [vmem:[%s5768_s2 + $0x380] sm:$0xff]  ;;  %v2935_v42 = vld [vmem:[%s5768_s2 + $0x4d0] sm:$0xff] }
  0xf7   : > { %823 = vmatprep.mubr.f32.mxu1 %v4400_v2  ;;  %993 = vmatprep.mubr.f32.mxu0 %v4400_v2  ;;  %v2845_v4 = vld [vmem:[%s5768_s2 + $0x200] sm:$0xff]  ;;  %v2938_v40 = vld [vmem:[%s5768_s2 + $0x4e8] sm:$0xff] }
  0xf8   : > { %3258 = vmatprep.subr.mxu1 %v2870_v8  ;;  %3308 = vmatprep.subr.mxu0 %v2902_v9  ;;  %v4464_v43 = vmax.f32 %v692_v28, 0.0  ;;  %v2924_v8 = vld [vmem:[%s5768_s2 + $0x478] sm:$0xff]  ;;  %v2937_v20 = vld [vmem:[%s5768_s2 + $0x4e0] sm:$0xff] }
  0xf9   : > { %824 = vmatmul.mubr.f32.gmra.mxu1 %v4410_v0  ;;  %994 = vmatmul.mubr.f32.gmra.mxu0 %v4410_v0  ;;  %v2956_v9 = vld [vmem:[%s5768_s2 + $0x578] sm:$0xff]  ;;  %v2969_v28 = vld [vmem:[%s5768_s2 + $0x5e0] sm:$0xff] }
  0xfa   : > { %3259 = vmatpush3.msra.mxu1 %v2854_v14  ;;  %3309 = vmatpush3.msra.mxu0 %v2886_v16  ;;  %v2939_v14 = vld [vmem:[%s5768_s2 + $0x4f0] sm:$0xff] }
  0xfb   : > { %3260 = vmatprep.subr.mxu1 %v2869_v30  ;;  %3310 = vmatprep.subr.mxu0 %v2901_v31  ;;  %v2971_v16 = vld [vmem:[%s5768_s2 + $0x5f0] sm:$0xff] }
  0xfc   : > { %3261 = vmatpush3.msra.mxu1 %v2853_v35  ;;  %3311 = vmatpush3.msra.mxu0 %v2885_v34  ;;  %v2923_v30 = vld [vmem:[%s5768_s2 + $0x470] sm:$0xff]  ;;  %v2922_v35 = vld [vmem:[%s5768_s2 + $0x468] sm:$0xff] }
  0xfd   : > { %828 = vmatprep.mubr.f32.mxu1 %v4432_v33  ;;  %998 = vmatprep.mubr.f32.mxu0 %v4432_v33  ;;  %v2955_v31 = vld [vmem:[%s5768_s2 + $0x570] sm:$0xff]  ;;  %v2954_v34 = vld [vmem:[%s5768_s2 + $0x568] sm:$0xff] }
  0xfe   : > { %3262 = vmatprep.subr.mxu1 %v2868_v37  ;;  %3312 = vmatprep.subr.mxu0 %v2900_v38  ;;  %v2921_v37 = vld [vmem:[%s5768_s2 + $0x460] sm:$0xff] }
  0xff   : > { %829 = vmatmul.mubr.f32.gmra.mxu1 %v4448_v32  ;;  %999 = vmatmul.mubr.f32.gmra.mxu0 %v4448_v32  ;;  %v2953_v38 = vld [vmem:[%s5768_s2 + $0x560] sm:$0xff] }
 0x100   : > { %3263 = vmatpush3.msra.mxu1 %v2852_v23  ;;  %3313 = vmatpush3.msra.mxu0 %v2884_v39  ;;  %v2936_v23 = vld [vmem:[%s5768_s2 + $0x4d8] sm:$0xff] }
 0x101   : > { %3264 = vmatprep.subr.mxu1 %v2867_v41  ;;  %3314 = vmatprep.subr.mxu0 %v2899_v25  ;;  %v2968_v39 = vld [vmem:[%s5768_s2 + $0x5d8] sm:$0xff] }
 0x102   : > { %3265 = vmatpush3.msra.mxu1 %v2851_v45  ;;  %3315 = vmatpush3.msra.mxu0 %v2883_v46  ;;  %v2920_v41 = vld [vmem:[%s5768_s2 + $0x458] sm:$0xff]  ;;  %v2967_v45 = vld [vmem:[%s5768_s2 + $0x5d0] sm:$0xff] }
 0x103   : > { %833 = vmatprep.mubr.f32.mxu1 %v4464_v43  ;;  %1003 = vmatprep.mubr.f32.mxu0 %v4464_v43  ;;  %v2952_v25 = vld [vmem:[%s5768_s2 + $0x558] sm:$0xff]  ;;  %v2919_v46 = vld [vmem:[%s5768_s2 + $0x450] sm:$0xff] }
 0x104   : > { %3266 = vmatprep.subr.mxu1 %v2866_v47  ;;  %3316 = vmatprep.subr.mxu0 %v2898_v19  ;;  %v2951_v47 = vld [vmem:[%s5768_s2 + $0x550] sm:$0xff]  ;;  %v2934_v19 = vld [vmem:[%s5768_s2 + $0x4c8] sm:$0xff] }
 0x105   : > { %834 = vmatmul.mubr.f32.gmra.mxu1 %v4480_v49  ;;  %1004 = vmatmul.mubr.f32.gmra.mxu0 %v4480_v49 }
 0x106   : > { %3267 = vmatpush3.msra.mxu1 %v2850_v21  ;;  %3317 = vmatpush3.msra.mxu0 %v2882_v50  ;;  %v2966_v21 = vld [vmem:[%s5768_s2 + $0x5c8] sm:$0xff] }
 0x107   : > { %3268 = vmatprep.subr.mxu1 %v2865_v51  ;;  %1142 = vmatprep.mubr.f32.mxu1 %v4318_v29  ;;  %v2918_v50 = vld [vmem:[%s5768_s2 + $0x448] sm:$0xff] }
 0x108   : > { %3318 = vmatprep.subr.mxu0 %v2897_v52  ;;  %1306 = vmatprep.mubr.f32.mxu0 %v4318_v29  ;;  %v2950_v51 = vld [vmem:[%s5768_s2 + $0x548] sm:$0xff]  ;;  %v2933_v52 = vld [vmem:[%s5768_s2 + $0x4c0] sm:$0xff] }
 0x109   : > { %3269 = vmatpush3.msra.mxu1 %v2849_v53  ;;  %3319 = vmatpush3.msra.mxu0 %v2881_v55  ;;  %v2965_v53 = vld [vmem:[%s5768_s2 + $0x5c0] sm:$0xff] }
 0x10a   : > { %3270 = vmatprep.subr.mxu1 %v2864_v15  ;;  %3320 = vmatprep.subr.mxu0 %v2896_v56  ;;  %v2917_v55 = vld [vmem:[%s5768_s2 + $0x440] sm:$0xff]  ;;  %v2932_v56 = vld [vmem:[%s5768_s2 + $0x4b8] sm:$0xff] }
 0x10b   : > { %3271 = vmatpush3.msra.mxu1 %v2848_v57  ;;  %3321 = vmatpush3.msra.mxu0 %v2880_v58  ;;  %v2949_v15 = vld [vmem:[%s5768_s2 + $0x540] sm:$0xff]  ;;  %v2964_v57 = vld [vmem:[%s5768_s2 + $0x5b8] sm:$0xff] }
 0x10c   : > { %3272 = vmatprep.subr.mxu1 %v2863_v59  ;;  %3322 = vmatprep.subr.mxu0 %v2895_v60  ;;  %v2916_v58 = vld [vmem:[%s5768_s2 + $0x438] sm:$0xff]  ;;  %v2931_v60 = vld [vmem:[%s5768_s2 + $0x4b0] sm:$0xff] }
 0x10d   : > { %3273 = vmatpush3.msra.mxu1 %v2847_v61  ;;  %3323 = vmatpush3.msra.mxu0 %v2879_v12  ;;  %v2948_v59 = vld [vmem:[%s5768_s2 + $0x538] sm:$0xff]  ;;  %v2963_v61 = vld [vmem:[%s5768_s2 + $0x5b0] sm:$0xff] }
 0x10e   : > { %3274 = vmatprep.subr.mxu1 %v2862_v13  ;;  %3324 = vmatprep.subr.mxu0 %v2894_v10  ;;  %v2915_v12 = vld [vmem:[%s5768_s2 + $0x430] sm:$0xff]  ;;  %v2930_v10 = vld [vmem:[%s5768_s2 + $0x4a8] sm:$0xff] }
 0x10f   : > { %3275 = vmatpush3.msra.mxu1 %v2846_v11  ;;  %3325 = vmatpush3.msra.mxu0 %v2878_v62  ;;  %v2947_v13 = vld [vmem:[%s5768_s2 + $0x530] sm:$0xff]  ;;  %v2962_v11 = vld [vmem:[%s5768_s2 + $0x5a8] sm:$0xff] }
 0x110   : > { %3276 = vmatprep.subr.mxu1 %v2861_v63  ;;  %3326 = vmatprep.subr.mxu0 %v2893_v3  ;;  %v2914_v62 = vld [vmem:[%s5768_s2 + $0x428] sm:$0xff]  ;;  %v2929_v3 = vld [vmem:[%s5768_s2 + $0x4a0] sm:$0xff] }
 0x111   : > { %3277 = vmatpush3.msra.mxu1 %v2845_v4  ;;  %3327 = vmatpush3.msra.mxu0 %v2877_v5  ;;  %v2946_v63 = vld [vmem:[%s5768_s2 + $0x528] sm:$0xff]  ;;  %v2961_v4 = vld [vmem:[%s5768_s2 + $0x5a0] sm:$0xff] }
 0x112   : > { %1143 = vmatmul.mubr.f32.vlgmr.msra.gmra.mxu1 %v4320_v36  ;;  %1307 = vmatmul.mubr.f32.vlgmr.msra.gmra.mxu0 %v4320_v36  ;;  %v2913_v5 = vld [vmem:[%s5768_s2 + $0x420] sm:$0xff] }
 0x113   : > { %3346 = vmatprep.subr.mxu1 %v2940_v6  ;;  %3396 = vmatprep.subr.mxu0 %v2972_v7  ;;  %v2945_v6 = vld [vmem:[%s5768_s2 + $0x520] sm:$0xff]  ;;  %v2928_v7 = vld [vmem:[%s5768_s2 + $0x498] sm:$0xff] }
 0x114   : > { %1147 = vmatprep.mubr.f32.mxu1 %v4344_v44  ;;  %1311 = vmatprep.mubr.f32.mxu0 %v4344_v44 }
 0x115   : > { %3347 = vmatpush3.msra.mxu1 %v2924_v8  ;;  %3397 = vmatpush3.msra.mxu0 %v2956_v9  ;;  %v2960_v8 = vld [vmem:[%s5768_s2 + $0x598] sm:$0xff] }
 0x116   : > { %3348 = vmatprep.subr.mxu1 %v2939_v14  ;;  %3398 = vmatprep.subr.mxu0 %v2971_v16  ;;  %v2912_v9 = vld [vmem:[%s5768_s2 + $0x418] sm:$0xff]  ;;  %v2927_v16 = vld [vmem:[%s5768_s2 + $0x490] sm:$0xff] }
 0x117   : > { %3349 = vmatpush3.msra.mxu1 %v2923_v30  ;;  %3399 = vmatpush3.msra.mxu0 %v2955_v31  ;;  %v2944_v14 = vld [vmem:[%s5768_s2 + $0x518] sm:$0xff]  ;;  %v2959_v30 = vld [vmem:[%s5768_s2 + $0x590] sm:$0xff] }
 0x118   : > { %1148 = vmatmul.mubr.f32.gmra.mxu1 %v4352_v48  ;;  %1312 = vmatmul.mubr.f32.gmra.mxu0 %v4352_v48  ;;  %v2911_v31 = vld [vmem:[%s5768_s2 + $0x410] sm:$0xff] }
 0x119   : > { %3350 = vmatprep.subr.mxu1 %v2938_v40  ;;  %3400 = vmatprep.subr.mxu0 %v2970_v24  ;;  %v2943_v40 = vld [vmem:[%s5768_s2 + $0x510] sm:$0xff]  ;;  %v3128_v24 = vpop.f32.mrf.mxu0 }
 0x11a   : > { %1152 = vmatprep.mubr.f32.mxu1 %v4368_v54  ;;  %1316 = vmatprep.mubr.f32.mxu0 %v4368_v54 }
 0x11b   : > { %3351 = vmatpush3.msra.mxu1 %v2922_v35  ;;  %3401 = vmatpush3.msra.mxu0 %v2954_v34  ;;  %v2926_v35 = vld [vmem:[%s5768_s2 + $0x488] sm:$0xff] }
 0x11c   : > { %3352 = vmatprep.subr.mxu1 %v2937_v20  ;;  %3402 = vmatprep.subr.mxu0 %v2969_v28  ;;  %v2958_v34 = vld [vmem:[%s5768_s2 + $0x588] sm:$0xff] }
 0x11d   : > { %3353 = vmatpush3.msra.mxu1 %v2921_v37  ;;  %3403 = vmatpush3.msra.mxu0 %v2953_v38  ;;  %v2910_v20 = vld [vmem:[%s5768_s2 + $0x408] sm:$0xff]  ;;  %v3129_v37 = vpop.f32.mrf.mxu0  ;;  %v2925_v38 = vld [vmem:[%s5768_s2 + $0x480] sm:$0xff] }
 0x11e   : > { %1153 = vmatmul.mubr.f32.gmra.mxu1 %v4378_v17  ;;  %1317 = vmatmul.mubr.f32.gmra.mxu0 %v4378_v17  ;;  %v2942_v28 = vld [vmem:[%s5768_s2 + $0x508] sm:$0xff] }
 0x11f   : > { %3354 = vmatprep.subr.mxu1 %v2936_v23  ;;  %3404 = vmatprep.subr.mxu0 %v2968_v39  ;;  %v2957_v23 = vld [vmem:[%s5768_s2 + $0x580] sm:$0xff]  ;;  %v3130_v39 = vadd.f32 %v3129_v37, %v3128_v24  ;;  %v3015_v37 = vld [vmem:[%s5768_s2 + $0x750] sm:$0xff] }
 0x120   : > { %1157 = vmatprep.mubr.f32.mxu1 %v4400_v2  ;;  %1321 = vmatprep.mubr.f32.mxu0 %v4400_v2 }
 0x121   : > { %3355 = vmatpush3.msra.mxu1 %v2920_v41  ;;  %3405 = vmatpush3.msra.mxu0 %v2952_v25  ;;  %v2909_v41 = vld [vmem:[%s5768_s2 + $0x400] sm:$0xff] }
 0x122   : > { %3356 = vmatprep.subr.mxu1 %v2935_v42  ;;  %3406 = vmatprep.subr.mxu0 %v2967_v45  ;;  %v2941_v25 = vld [vmem:[%s5768_s2 + $0x500] sm:$0xff]  ;;  %v3131_v42 = vpop.f32.mrf.mxu0  ;;  %v519_v45 = vmax.f32 %v3130_v39, 0.0  ;;  %v2998_v39 = vld [vmem:[%s5768_s2 + $0x6c8] sm:$0xff] }
 0x123   : > { %3357 = vmatpush3.msra.mxu1 %v2919_v46  ;;  %3407 = vmatpush3.msra.mxu0 %v2951_v47  ;;  %v3004_v46 = vld [vmem:[%s5768_s2 + $0x6f8] sm:$0xff] }
 0x124   : > { %1158 = vmatmul.mubr.f32.gmra.mxu1 %v4410_v0  ;;  %1322 = vmatmul.mubr.f32.gmra.mxu0 %v4410_v0  ;;  %v3036_v47 = vld [vmem:[%s5768_s2 + $0x7f8] sm:$0xff]  ;;  %526 = vst.msk [vmem:[%s4774_s30] sm:$0xff] %vm525_vm1, %v519_v45  ;;  %v3014_v45 = vld [vmem:[%s5768_s2 + $0x748] sm:$0xff] }
 0x125   : > { %3358 = vmatprep.subr.mxu1 %v2934_v19  ;;  %3408 = vmatprep.subr.mxu0 %v2966_v21  ;;  %v3132_v19 = vpop.f32.mrf.mxu0 }
 0x126   : > { %1162 = vmatprep.mubr.f32.mxu1 %v4432_v33  ;;  %1326 = vmatprep.mubr.f32.mxu0 %v4432_v33  ;;  %v3133_v21 = vadd.f32 %v3132_v19, %v3131_v42  ;;  %v2982_v42 = vld [vmem:[%s5768_s2 + $0x648] sm:$0xff]  ;;  %v2981_v19 = vld [vmem:[%s5768_s2 + $0x640] sm:$0xff] }
 0x127   : > { %3359 = vmatpush3.msra.mxu1 %v2918_v50  ;;  %3409 = vmatpush3.msra.mxu0 %v2950_v51  ;;  %v2988_v50 = vld [vmem:[%s5768_s2 + $0x678] sm:$0xff] }
 0x128   : > { %3360 = vmatprep.subr.mxu1 %v2933_v52  ;;  %3410 = vmatprep.subr.mxu0 %v2965_v53  ;;  %v3020_v51 = vld [vmem:[%s5768_s2 + $0x778] sm:$0xff]  ;;  %v3134_v52 = vpop.f32.mrf.mxu0  ;;  %v3003_v53 = vld [vmem:[%s5768_s2 + $0x6f0] sm:$0xff] }
 0x129   : > { %3361 = vmatpush3.msra.mxu1 %v2917_v55  ;;  %3411 = vmatpush3.msra.mxu0 %v2949_v15  ;;  %v3035_v55 = vld [vmem:[%s5768_s2 + $0x7f0] sm:$0xff]  ;;  %v520_v15 = vmax.f32 %v3133_v21, 0.0  ;;  %v3013_v21 = vld [vmem:[%s5768_s2 + $0x740] sm:$0xff] }
 0x12a   : > { %1163 = vmatmul.mubr.f32.gmra.mxu1 %v4448_v32  ;;  %1327 = vmatmul.mubr.f32.gmra.mxu0 %v4448_v32 }
 0x12b   : > { %3362 = vmatprep.subr.mxu1 %v2932_v56  ;;  %3412 = vmatprep.subr.mxu0 %v2964_v57  ;;  %v2987_v56 = vld [vmem:[%s5768_s2 + $0x670] sm:$0xff]  ;;  %527 = vst.msk [vmem:[%s4774_s30 + $0x8] sm:$0xff] %vm525_vm1, %v520_v15 }
 0x12c   : > { %1167 = vmatprep.mubr.f32.mxu1 %v4464_v43  ;;  %1331 = vmatprep.mubr.f32.mxu0 %v4464_v43  ;;  %v3019_v57 = vld [vmem:[%s5768_s2 + $0x770] sm:$0xff] }
 0x12d   : > { %3363 = vmatpush3.msra.mxu1 %v2916_v58  ;;  %3413 = vmatpush3.msra.mxu0 %v2948_v59  ;;  %v3135_v58 = vpop.f32.mrf.mxu0  ;;  %v3027_v15 = vld [vmem:[%s5768_s2 + $0x7b0] sm:$0xff] }
 0x12e   : > { %3364 = vmatprep.subr.mxu1 %v2931_v60  ;;  %3414 = vmatprep.subr.mxu0 %v2963_v61  ;;  %v3136_v59 = vadd.f32 %v3135_v58, %v3134_v52  ;;  %v3002_v60 = vld [vmem:[%s5768_s2 + $0x6e8] sm:$0xff]  ;;  %v2980_v52 = vld [vmem:[%s5768_s2 + $0x638] sm:$0xff] }
 0x12f   : > { %3365 = vmatpush3.msra.mxu1 %v2915_v12  ;;  %3415 = vmatpush3.msra.mxu0 %v2947_v13  ;;  %v3034_v61 = vld [vmem:[%s5768_s2 + $0x7e8] sm:$0xff]  ;;  %v3137_v12 = vpop.f32.mrf.mxu0 }
 0x130   : > { %1168 = vmatmul.mubr.f32.gmra.mxu1 %v4480_v49  ;;  %1332 = vmatmul.mubr.f32.gmra.mxu0 %v4480_v49  ;;  %v521_v13 = vmax.f32 %v3136_v59, 0.0  ;;  %v2994_v58 = vld [vmem:[%s5768_s2 + $0x6a8] sm:$0xff] }
 0x131   : > { %3366 = vmatprep.subr.mxu1 %v2930_v10  ;;  %3416 = vmatprep.subr.mxu0 %v2962_v11  ;;  %v2986_v10 = vld [vmem:[%s5768_s2 + $0x668] sm:$0xff] }
 0x132   : > { %3367 = vmatpush3.msra.mxu1 %v2914_v62  ;;  %1470 = vmatprep.mubr.f32.mxu1 %v4318_v29  ;;  %v3018_v11 = vld [vmem:[%s5768_s2 + $0x768] sm:$0xff]  ;;  %v3138_v62 = vpop.f32.mrf.mxu0  ;;  %528 = vst.msk [vmem:[%s4774_s30 + $0x10] sm:$0xff] %vm525_vm1, %v521_v13  ;;  %v3025_v13 = vld [vmem:[%s5768_s2 + $0x7a0] sm:$0xff] }
 0x133   : > { %3417 = vmatpush3.msra.mxu0 %v2946_v63  ;;  %1634 = vmatprep.mubr.f32.mxu0 %v4318_v29  ;;  %v3001_v63 = vld [vmem:[%s5768_s2 + $0x6e0] sm:$0xff]  ;;  %v3026_v59 = vld [vmem:[%s5768_s2 + $0x7a8] sm:$0xff] }
 0x134   : > { %3368 = vmatprep.subr.mxu1 %v2929_v3  ;;  %3418 = vmatprep.subr.mxu0 %v2961_v4  ;;  %v3033_v3 = vld [vmem:[%s5768_s2 + $0x7e0] sm:$0xff]  ;;  %v3139_v4 = vadd.f32 %v3138_v62, %v3137_v12  ;;  %v2992_v62 = vld [vmem:[%s5768_s2 + $0x698] sm:$0xff] }
 0x135   : > { %3369 = vmatpush3.msra.mxu1 %v2913_v5  ;;  %3419 = vmatpush3.msra.mxu0 %v2945_v6  ;;  %v2985_v5 = vld [vmem:[%s5768_s2 + $0x660] sm:$0xff] }
 0x136   : > { %3370 = vmatprep.subr.mxu1 %v2928_v7  ;;  %3420 = vmatprep.subr.mxu0 %v2960_v8  ;;  %v3017_v6 = vld [vmem:[%s5768_s2 + $0x760] sm:$0xff]  ;;  %v3140_v7 = vpop.f32.mrf.mxu0  ;;  %v522_v8 = vmax.f32 %v3139_v4, 0.0  ;;  %v3008_v4 = vld [vmem:[%s5768_s2 + $0x718] sm:$0xff] }
 0x137   : > { %3371 = vmatpush3.msra.mxu1 %v2912_v9  ;;  %3421 = vmatpush3.msra.mxu0 %v2944_v14  ;;  %v3000_v9 = vld [vmem:[%s5768_s2 + $0x6d8] sm:$0xff]  ;;  %v2993_v12 = vld [vmem:[%s5768_s2 + $0x6a0] sm:$0xff] }
 0x138   : > { %3372 = vmatprep.subr.mxu1 %v2927_v16  ;;  %3422 = vmatprep.subr.mxu0 %v2959_v30  ;;  %v3032_v14 = vld [vmem:[%s5768_s2 + $0x7d8] sm:$0xff]  ;;  %v3141_v16 = vpop.f32.mrf.mxu0  ;;  %529 = vst.msk [vmem:[%s4774_s30 + $0x18] sm:$0xff] %vm525_vm1, %v522_v8  ;;  %v2975_v8 = vld [vmem:[%s5768_s2 + $0x610] sm:$0xff] }
 0x139   : > { %3373 = vmatpush3.msra.mxu1 %v2911_v31  ;;  %3423 = vmatpush3.msra.mxu0 %v2943_v40  ;;  %v3142_v30 = vadd.f32 %v3141_v16, %v3140_v7  ;;  %v2984_v31 = vld [vmem:[%s5768_s2 + $0x658] sm:$0xff]  ;;  %v4974_v7 = vpop.permute.xlu1 %846  ;;  %v3022_v16 = vld [vmem:[%s5768_s2 + $0x788] sm:$0xff] }
 0x13a   : > { %3374 = vmatprep.subr.mxu1 %v2926_v35  ;;  %3424 = vmatprep.subr.mxu0 %v2958_v34  ;;  %v3016_v40 = vld [vmem:[%s5768_s2 + $0x758] sm:$0xff]  ;;  %v3143_v24 = vpop.f32.mrf.mxu0  ;;  %v2999_v35 = vld [vmem:[%s5768_s2 + $0x6d0] sm:$0xff] }
 0x13b   : > { %3375 = vmatpush3.msra.mxu1 %v2910_v20  ;;  %3425 = vmatpush3.msra.mxu0 %v2942_v28  ;;  %v3031_v34 = vld [vmem:[%s5768_s2 + $0x7d0] sm:$0xff]  ;;  %v523_v20 = vmax.f32 %v3142_v30, 0.0  ;;  %v2974_v30 = vld [vmem:[%s5768_s2 + $0x608] sm:$0xff] }
 0x13c   : > { %3376 = vmatprep.subr.mxu1 %v2925_v38  ;;  %3426 = vmatprep.subr.mxu0 %v2957_v23  ;;  %v2983_v28 = vld [vmem:[%s5768_s2 + $0x650] sm:$0xff]  ;;  %v3144_v38 = vpop.f32.mrf.mxu0 }
 0x13d   : > { %3377 = vmatpush3.msra.mxu1 %v2909_v41  ;;  %3427 = vmatpush3.msra.mxu0 %v2941_v25  ;;  %530 = vst.msk [vmem:[%s4774_s30 + $0x20] sm:$0xff] %vm525_vm1, %v523_v20  ;;  %v3145_v23 = vadd.f32 %v3144_v38, %v3143_v24  ;;  %v3030_v41 = vld [vmem:[%s5768_s2 + $0x7c8] sm:$0xff]  ;;  %v3021_v24 = vld [vmem:[%s5768_s2 + $0x780] sm:$0xff]  ;;  %v5006_v20 = vpop.permute.xlu1 %856  ;;  %v3052_v38 = vld [vmem:[%s5768_s2 + $0x878] sm:$0xff] }
 0x13e   : > { %1471 = vmatmul.mubr.f32.vlgmr.msra.gmra.mxu1 %v4320_v36  ;;  %1635 = vmatmul.mubr.f32.vlgmr.msra.gmra.mxu0 %v4320_v36 }
 0x13f   : > { %3446 = vmatprep.subr.mxu1 %v3004_v46  ;;  %3496 = vmatprep.subr.mxu0 %v3036_v47  ;;  %v524_v25 = vmax.f32 %v3145_v23, 0.0  ;;  %v2997_v46 = vld [vmem:[%s5768_s2 + $0x6c0] sm:$0xff]  ;;  %v3067_v23 = vld [vmem:[%s5768_s2 + $0x8f0] sm:$0xff] }
 0x140   : > { %1475 = vmatprep.mubr.f32.mxu1 %v4344_v44  ;;  %1639 = vmatprep.mubr.f32.mxu0 %v4344_v44  ;;  %v3029_v47 = vld [vmem:[%s5768_s2 + $0x7c0] sm:$0xff] }
 0x141   : > { %3447 = vmatpush3.msra.mxu1 %v2988_v50  ;;  %3497 = vmatpush3.msra.mxu0 %v3020_v51  ;;  %531 = vst.msk [vmem:[%s4774_s30 + $0x28] sm:$0xff] %vm525_vm1, %v524_v25  ;;  %v2996_v50 = vld [vmem:[%s5768_s2 + $0x6b8] sm:$0xff]  ;;  %v5030_v25 = vpop.permute.xlu1 %1030 }
 0x142   : > { %3448 = vmatprep.subr.mxu1 %v3003_v53  ;;  %3498 = vmatprep.subr.mxu0 %v3035_v55  ;;  %v3028_v51 = vld [vmem:[%s5768_s2 + $0x7b8] sm:$0xff]  ;;  %v2995_v55 = vld [vmem:[%s5768_s2 + $0x6b0] sm:$0xff] }
 0x143   : > { %3449 = vmatpush3.msra.mxu1 %v2987_v56  ;;  %3499 = vmatpush3.msra.mxu0 %v3019_v57  ;;  %v3012_v53 = vld [vmem:[%s5768_s2 + $0x738] sm:$0xff]  ;;  %v2979_v56 = vld [vmem:[%s5768_s2 + $0x630] sm:$0xff] }
 0x144   : > { %1476 = vmatmul.mubr.f32.gmra.mxu1 %v4352_v48  ;;  %1640 = vmatmul.mubr.f32.gmra.mxu0 %v4352_v48  ;;  %v3011_v57 = vld [vmem:[%s5768_s2 + $0x730] sm:$0xff] }
 0x145   : > { %3450 = vmatprep.subr.mxu1 %v3002_v60  ;;  %3500 = vmatprep.subr.mxu0 %v3034_v61  ;;  %v2978_v60 = vld [vmem:[%s5768_s2 + $0x628] sm:$0xff] }
 0x146   : > { %1480 = vmatprep.mubr.f32.mxu1 %v4368_v54  ;;  %1644 = vmatprep.mubr.f32.mxu0 %v4368_v54  ;;  %v3010_v61 = vld [vmem:[%s5768_s2 + $0x728] sm:$0xff] }
 0x147   : > { %3451 = vmatpush3.msra.mxu1 %v2986_v10  ;;  %3501 = vmatpush3.msra.mxu0 %v3018_v11  ;;  %v2977_v10 = vld [vmem:[%s5768_s2 + $0x620] sm:$0xff] }
 0x148   : > { %3452 = vmatprep.subr.mxu1 %v3001_v63  ;;  %3502 = vmatprep.subr.mxu0 %v3033_v3  ;;  %v3009_v11 = vld [vmem:[%s5768_s2 + $0x720] sm:$0xff]  ;;  %v3024_v63 = vld [vmem:[%s5768_s2 + $0x798] sm:$0xff] }
 0x149   : > { %3453 = vmatpush3.msra.mxu1 %v2985_v5  ;;  %3503 = vmatpush3.msra.mxu0 %v3017_v6  ;;  %v2976_v3 = vld [vmem:[%s5768_s2 + $0x618] sm:$0xff]  ;;  %v2991_v5 = vld [vmem:[%s5768_s2 + $0x690] sm:$0xff] }
 0x14a   : > { %1481 = vmatmul.mubr.f32.gmra.mxu1 %v4378_v17  ;;  %1645 = vmatmul.mubr.f32.gmra.mxu0 %v4378_v17  ;;  %v3023_v6 = vld [vmem:[%s5768_s2 + $0x790] sm:$0xff] }
 0x14b   : > { %3454 = vmatprep.subr.mxu1 %v3000_v9  ;;  %3504 = vmatprep.subr.mxu0 %v3032_v14  ;;  %v3007_v9 = vld [vmem:[%s5768_s2 + $0x710] sm:$0xff]  ;;  %v2990_v14 = vld [vmem:[%s5768_s2 + $0x688] sm:$0xff] }
 0x14c   : > { %1485 = vmatprep.mubr.f32.mxu1 %v4400_v2  ;;  %1649 = vmatprep.mubr.f32.mxu0 %v4400_v2 }
 0x14d   : > { %3455 = vmatpush3.msra.mxu1 %v2984_v31  ;;  %3505 = vmatpush3.msra.mxu0 %v3016_v40  ;;  %v3006_v31 = vld [vmem:[%s5768_s2 + $0x708] sm:$0xff]  ;;  %v2989_v40 = vld [vmem:[%s5768_s2 + $0x680] sm:$0xff] }
 0x14e   : > { %3456 = vmatprep.subr.mxu1 %v2999_v35  ;;  %3506 = vmatprep.subr.mxu0 %v3031_v34  ;;  %v2973_v35 = vld [vmem:[%s5768_s2 + $0x600] sm:$0xff] }
 0x14f   : > { %3457 = vmatpush3.msra.mxu1 %v2983_v28  ;;  %3507 = vmatpush3.msra.mxu0 %v3015_v37  ;;  %v3005_v34 = vld [vmem:[%s5768_s2 + $0x700] sm:$0xff]  ;;  %v3068_v28 = vld [vmem:[%s5768_s2 + $0x8f8] sm:$0xff]  ;;  %v3769_v37 = vmov 7  }
 0x150   : > { %1486 = vmatmul.mubr.f32.gmra.mxu1 %v4410_v0  ;;  %1650 = vmatmul.mubr.f32.gmra.mxu0 %v4410_v0 }
 0x151   : > { %3458 = vmatprep.subr.mxu1 %v2998_v39  ;;  %3508 = vmatprep.subr.mxu0 %v3030_v41  ;;  %v5023_v39 = vld [vmem:[%s5771_s5 + $0x28] sm:$0xff]  ;;  %v3051_v41 = vld [vmem:[%s5768_s2 + $0x870] sm:$0xff] }
 0x152   : > { %1490 = vmatprep.mubr.f32.mxu1 %v4432_v33  ;;  %1654 = vmatprep.mubr.f32.mxu0 %v4432_v33 }
 0x153   : > { %3459 = vmatpush3.msra.mxu1 %v2982_v42  ;;  %3509 = vmatpush3.msra.mxu0 %v3014_v45  ;;  %v3066_v42 = vld [vmem:[%s5768_s2 + $0x8e8] sm:$0xff] }
 0x154   : > { %3460 = vmatprep.subr.mxu1 %v2997_v46  ;;  %3510 = vmatprep.subr.mxu0 %v3029_v47  ;;  %v3050_v45 = vld [vmem:[%s5768_s2 + $0x868] sm:$0xff]  ;;  %v3065_v46 = vld [vmem:[%s5768_s2 + $0x8e0] sm:$0xff] }
 0x155   : > { %3461 = vmatpush3.msra.mxu1 %v2981_v19  ;;  %3511 = vmatpush3.msra.mxu0 %v3013_v21  ;;  %v3049_v47 = vld [vmem:[%s5768_s2 + $0x860] sm:$0xff]  ;;  %v5059_v21 = vpop.permute.xlu1 %1026 }
 0x156   : > { %1491 = vmatmul.mubr.f32.gmra.mxu1 %v4448_v32  ;;  %1655 = vmatmul.mubr.f32.gmra.mxu0 %v4448_v32  ;;  %v5053_v19 = vld [vmem:[%s5771_s5] sm:$0xff] }
 0x157   : > { %3462 = vmatprep.subr.mxu1 %v2996_v50  ;;  %3512 = vmatprep.subr.mxu0 %v3028_v51  ;;  %v3048_v50 = vld [vmem:[%s5768_s2 + $0x858] sm:$0xff]  ;;  %v3063_v51 = vld [vmem:[%s5768_s2 + $0x8d0] sm:$0xff] }
 0x158   : > { %1495 = vmatprep.mubr.f32.mxu1 %v4464_v43  ;;  %1659 = vmatprep.mubr.f32.mxu0 %v4464_v43 }
 0x159   : > { %3463 = vmatpush3.msra.mxu1 %v2980_v52  ;;  %3513 = vmatpush3.msra.mxu0 %v3012_v53  ;;  %v3047_v52 = vld [vmem:[%s5768_s2 + $0x850] sm:$0xff]  ;;  %v3062_v53 = vld [vmem:[%s5768_s2 + $0x8c8] sm:$0xff] }
 0x15a   : > { %3464 = vmatprep.subr.mxu1 %v2995_v55  ;;  %3514 = vmatprep.subr.mxu0 %v3027_v15  ;;  %v5081_v55 = vld [vmem:[%s5771_s5 + $0x10] sm:$0xff]  ;;  %v3046_v15 = vld [vmem:[%s5768_s2 + $0x848] sm:$0xff] }
 0x15b   : > { %3465 = vmatpush3.msra.mxu1 %v2979_v56  ;;  %3515 = vmatpush3.msra.mxu0 %v3011_v57  ;;  %v5087_v56 = vpop.permute.xlu1 %1022  ;;  %v3061_v57 = vld [vmem:[%s5768_s2 + $0x8c0] sm:$0xff] }
 0x15c   : > { %1496 = vmatmul.mubr.f32.gmra.mxu1 %v4480_v49  ;;  %1660 = vmatmul.mubr.f32.gmra.mxu0 %v4480_v49 }
 0x15d   : > { %3466 = vmatprep.subr.mxu1 %v2994_v58  ;;  %3516 = vmatprep.subr.mxu0 %v3026_v59  ;;  %v3045_v58 = vld [vmem:[%s5768_s2 + $0x840] sm:$0xff]  ;;  %v3060_v59 = vld [vmem:[%s5768_s2 + $0x8b8] sm:$0xff] }
 0x15e   : > { %3467 = vmatpush3.msra.mxu1 %v2978_v60  ;;  %1798 = vmatprep.mubr.f32.mxu1 %v4318_v29  ;;  %v5106_v60 = vld [vmem:[%s5771_s5 + $0x18] sm:$0xff] }
 0x15f   : > { %3517 = vmatpush3.msra.mxu0 %v3010_v61  ;;  %1962 = vmatprep.mubr.f32.mxu0 %v4318_v29  ;;  %v3044_v61 = vld [vmem:[%s5768_s2 + $0x838] sm:$0xff] }
 0x160   : > { %3468 = vmatprep.subr.mxu1 %v2993_v12  ;;  %3518 = vmatprep.subr.mxu0 %v3025_v13  ;;  %v3059_v12 = vld [vmem:[%s5768_s2 + $0x8b0] sm:$0xff]  ;;  %v5117_v13 = vpop.permute.xlu1 %1190 }
 0x161   : > { %3469 = vmatpush3.msra.mxu1 %v2977_v10  ;;  %3519 = vmatpush3.msra.mxu0 %v3009_v11  ;;  %v3043_v10 = vld [vmem:[%s5768_s2 + $0x830] sm:$0xff]  ;;  %v3058_v11 = vld [vmem:[%s5768_s2 + $0x8a8] sm:$0xff] }
 0x162   : > { %3470 = vmatprep.subr.mxu1 %v2992_v62  ;;  %3520 = vmatprep.subr.mxu0 %v3024_v63  ;;  %v3770_v62 = vmov 8   ;;  %v3042_v63 = vld [vmem:[%s5768_s2 + $0x828] sm:$0xff] }
 0x163   : > { %3471 = vmatpush3.msra.mxu1 %v2976_v3  ;;  %3521 = vmatpush3.msra.mxu0 %v3008_v4  ;;  %v3057_v3 = vld [vmem:[%s5768_s2 + $0x8a0] sm:$0xff] }
 0x164   : > { %3472 = vmatprep.subr.mxu1 %v2991_v5  ;;  %3522 = vmatprep.subr.mxu0 %v3023_v6  ;;  %v3041_v4 = vld [vmem:[%s5768_s2 + $0x820] sm:$0xff]  ;;  %v3056_v5 = vld [vmem:[%s5768_s2 + $0x898] sm:$0xff]  ;;  %v5143_v6 = vpop.permute.xlu1 %1018 }
 0x165   : > { %3473 = vmatpush3.msra.mxu1 %v2975_v8  ;;  %3523 = vmatpush3.msra.mxu0 %v3007_v9  ;;  %v3040_v8 = vld [vmem:[%s5768_s2 + $0x818] sm:$0xff]  ;;  %v3055_v9 = vld [vmem:[%s5768_s2 + $0x890] sm:$0xff] }
 0x166   : > { %3474 = vmatprep.subr.mxu1 %v2990_v14  ;;  %3524 = vmatprep.subr.mxu0 %v3022_v16  ;;  %v3039_v14 = vld [vmem:[%s5768_s2 + $0x810] sm:$0xff]  ;;  %v3054_v16 = vld [vmem:[%s5768_s2 + $0x888] sm:$0xff] }
 0x167   : > { %3475 = vmatpush3.msra.mxu1 %v2974_v30  ;;  %3525 = vmatpush3.msra.mxu0 %v3006_v31  ;;  %v3038_v30 = vld [vmem:[%s5768_s2 + $0x808] sm:$0xff]  ;;  %v3053_v31 = vld [vmem:[%s5768_s2 + $0x880] sm:$0xff] }
 0x168   : > { %3476 = vmatprep.subr.mxu1 %v2989_v40  ;;  %3526 = vmatprep.subr.mxu0 %v3021_v24  ;;  %v5170_v40 = vpop.permute.xlu1 %1186 }
 0x169   : > { %3477 = vmatpush3.msra.mxu1 %v2973_v35  ;;  %3527 = vmatpush3.msra.mxu0 %v3005_v34 }
 0x16a   : > { %3725 = vset.pattern.permute.xlu1 %v3769_v37  ;;  %1799 = vmatmul.mubr.f32.vlgmr.msra.gmra.mxu1 %v4320_v36 }
 0x16b   : > { %1963 = vmatmul.mubr.f32.vlgmr.msra.gmra.mxu0 %v4320_v36  ;;  %3546 = vmatprep.subr.mxu1 %v3068_v28 }
 0x16c   : > { %2014 = vperm.xlu1 %3725, %v5023_v39   ;;  %1803 = vmatprep.mubr.f32.mxu1 %v4344_v44  ;;  %v5181_v24 = vpop.permute.xlu1 %1522 }
 0x16d   : > { %1967 = vmatprep.mubr.f32.mxu0 %v4344_v44  ;;  %3547 = vmatpush3.msra.mxu1 %v3052_v38 }
 0x16e   : > { %3548 = vmatprep.subr.mxu1 %v3067_v23  ;;  %1804 = vmatmul.mubr.f32.gmra.mxu1 %v4352_v48 }
 0x16f   : > { %3549 = vmatpush3.msra.mxu1 %v3051_v41  ;;  %1968 = vmatmul.mubr.f32.gmra.mxu0 %v4352_v48 }
 0x170   : > { %3550 = vmatprep.subr.mxu1 %v3066_v42  ;;  %3726 = vset.pattern.permute.xlu1 %v3766_v22  ;;  %v3064_v22 = vld [vmem:[%s5768_s2 + $0x8d8] sm:$0xff]  ;;  %v5188_v35 = vpop.permute.xlu1 %1182  ;;  %v2260_v42 = vld [vmem:[%s5774_s8 + $0x8] sm:$0xff] }
 0x171   : > { %1808 = vmatprep.mubr.f32.mxu1 %v4368_v54  ;;  %1972 = vmatprep.mubr.f32.mxu0 %v4368_v54 }
 0x172   : > { %3551 = vmatpush3.msra.mxu1 %v3050_v45  ;;  %1338 = vperm.xlu1 %3726, %v5053_v19  }
 0x173   : > { %3552 = vmatprep.subr.mxu1 %v3065_v46  ;;  %1809 = vmatmul.mubr.f32.gmra.mxu1 %v4378_v17 }
 0x174   : > { %3553 = vmatpush3.msra.mxu1 %v3049_v47  ;;  %1973 = vmatmul.mubr.f32.gmra.mxu0 %v4378_v17 }
 0x175   : > { %3554 = vmatprep.subr.mxu1 %v3064_v22  ;;  %1813 = vmatprep.mubr.f32.mxu1 %v4400_v2 }
 0x176   : > { %1977 = vmatprep.mubr.f32.mxu0 %v4400_v2  ;;  %3555 = vmatpush3.msra.mxu1 %v3048_v50 }
 0x177   : > { %3728 = vset.pattern.permute.xlu1 %v3767_v26  ;;  %3556 = vmatprep.subr.mxu1 %v3063_v51 }
 0x178   : > { %1674 = vperm.xlu1 %3728, %v5081_v55   ;;  %3557 = vmatpush3.msra.mxu1 %v3047_v52  ;;  %v2262_v52 = vld [vmem:[%s5774_s8 + $0x18] sm:$0xff] }
 0x179   : > { %1814 = vmatmul.mubr.f32.gmra.mxu1 %v4410_v0  ;;  %1978 = vmatmul.mubr.f32.gmra.mxu0 %v4410_v0 }
 0x17a   : > { %3558 = vmatprep.subr.mxu1 %v3062_v53  ;;  %1818 = vmatprep.mubr.f32.mxu1 %v4432_v33 }
 0x17b   : > { %1982 = vmatprep.mubr.f32.mxu0 %v4432_v33  ;;  %3559 = vmatpush3.msra.mxu1 %v3046_v15 }
 0x17c   : > { %3560 = vmatprep.subr.mxu1 %v3061_v57  ;;  %3729 = vset.pattern.permute.xlu1 %v3768_v27 }
 0x17d   : > { %3561 = vmatpush3.msra.mxu1 %v3045_v58  ;;  %1842 = vperm.xlu1 %3729, %v5106_v60  }
 0x17e   : > { %1819 = vmatmul.mubr.f32.gmra.mxu1 %v4448_v32  ;;  %1983 = vmatmul.mubr.f32.gmra.mxu0 %v4448_v32 }
 0x17f   : > { %3562 = vmatprep.subr.mxu1 %v3060_v59  ;;  %1823 = vmatprep.mubr.f32.mxu1 %v4464_v43 }
 0x180   : > { %1987 = vmatprep.mubr.f32.mxu0 %v4464_v43  ;;  %3563 = vmatpush3.msra.mxu1 %v3044_v61  ;;  %v2264_v61 = vld [vmem:[%s5774_s8 + $0x28] sm:$0xff] }
 0x181   : > { %3564 = vmatprep.subr.mxu1 %v3059_v12  ;;  %3730 = vset.pattern.permute.xlu1 %v3770_v62 }
 0x182   : > { %3565 = vmatpush3.msra.mxu1 %v3043_v10  ;;  %1988 = vmatmul.mubr.f32.gmra.mxu0 %v4480_v49 }
 0x183   : > { %1824 = vmatmul.mubr.f32.gmra.mxu1 %v4480_v49  ;;  %3566 = vmatprep.subr.mxu1 %v3058_v11 }
 0x184   : > { %2178 = vperm.xlu1 %3730, %v5023_v39   ;;  %3567 = vmatpush3.msra.mxu1 %v3042_v63 }
 0x185   : > { %2126 = vmatprep.mubr.f32.mxu1 %v4318_v29  ;;  %3568 = vmatprep.subr.mxu1 %v3057_v3  ;;  %v3751_v29 = vld [vmem:[%s5771_s5 + $0x20] sm:$0xff] }
 0x186   : > { %3569 = vmatpush3.msra.mxu1 %v3041_v4  ;;  %3734 = vset.pattern.permute.xlu0 %v3770_v62 }
 0x187   : > { %3570 = vmatprep.subr.mxu1 %v3056_v5  ;;  %2174 = vperm.xlu0 %3734, %v3751_v29  }
 0x188   : > { %3731 = vset.pattern.permute.xlu1 %v3765_v18  ;;  %3571 = vmatpush3.msra.mxu1 %v3040_v8  ;;  %v3037_v18 = vld [vmem:[%s5768_s2 + $0x800] sm:$0xff] }
 0x189   : > { %1502 = vperm.xlu1 %3731, %v5053_v19   ;;  %3572 = vmatprep.subr.mxu1 %v3055_v9 }
 0x18a   : > { %3573 = vmatpush3.msra.mxu1 %v3039_v14 }
 0x18b   : > { %3574 = vmatprep.subr.mxu1 %v3054_v16  ;;  %3735 = vset.pattern.permute.xlu0 %v3769_v37 }
 0x18c   : > { %3575 = vmatpush3.msra.mxu1 %v3038_v30  ;;  %2010 = vperm.xlu0 %3735, %v3751_v29  }
 0x18d   : > { %3732 = vset.pattern.permute.xlu1 %v3768_v27  ;;  %3576 = vmatprep.subr.mxu1 %v3053_v31 }
 0x18e   : > { %1838 = vperm.xlu1 %3732, %v5081_v55   ;;  %3577 = vmatpush3.msra.mxu1 %v3037_v18 }
 0x18f   : > { %2127 = vmatmul.mubr.f32.vlgmr.msra.gmra.mxu1 %v4320_v36  ;;  %v842_v36 = vpop.permute.xlu0 %841 }
 0x190   : > { %2131 = vmatprep.mubr.f32.mxu1 %v4344_v44  ;;  %2002 = vperm.xlu0 %3735, %v5081_v55   ;;  %v2197_v44 = vld [vmem:[%s5772_s6 + $0x20] sm:$0xff] }
 0x192   : > { %3733 = vset.pattern.permute.xlu1 %v3769_v37 }
 0x193   : > { %2006 = vperm.xlu1 %3733, %v5106_v60   ;;  %2132 = vmatmul.mubr.f32.gmra.mxu1 %v4352_v48  ;;  %v5206_v48 = vld [vmem:[%s5771_s5 + $0x8] sm:$0xff] }
 0x194   : > { %2136 = vmatprep.mubr.f32.mxu1 %v4368_v54  ;;  %3738 = vset.pattern.permute.xlu0 %v3768_v27  ;;  %v852_v54 = vpop.permute.xlu0 %851 }
 0x195   : > { %1846 = vperm.xlu0 %3738, %v3751_v29   ;;  %v2268_v29 = vld [vmem:[%s5774_s8 + $0x48] sm:$0xff] }
 0x197   : > { %3736 = vset.pattern.permute.xlu1 %v3767_v26  ;;  %2137 = vmatmul.mubr.f32.gmra.mxu1 %v4378_v17  ;;  %v5201_v26 = vpop.permute.xlu1 %1350  ;;  %v2196_v17 = vld [vmem:[%s5772_s6 + $0x18] sm:$0xff] }
 0x198   : > { %1666 = vperm.xlu1 %3736, %v5053_v19   ;;  %2141 = vmatprep.mubr.f32.mxu1 %v4400_v2  ;;  %v2195_v2 = vld [vmem:[%s5772_s6 + $0x10] sm:$0xff] }
 0x199   : > { %1830 = vperm.xlu0 %3738, %v5053_v19  }
 0x19b   : > { %2142 = vmatmul.mubr.f32.gmra.mxu1 %v4410_v0  ;;  %v5223_v0 = vpop.permute.xlu0 %866 }
 0x19c   : > { %2146 = vmatprep.mubr.f32.mxu1 %v4432_v33  ;;  %3737 = vset.pattern.permute.xlu1 %v3768_v27  ;;  %v5217_v27 = vpop.permute.xlu1 %1686  ;;  %v2198_v33 = vld [vmem:[%s5772_s6 + $0x28] sm:$0xff] }
 0x19d   : > { %1834 = vperm.xlu1 %3737, %v5206_v48   ;;  %3743 = vset.pattern.permute.xlu0 %v3762_v1  ;;  %5777 = vst [vmem:[#allocation2_spill] sm:$0xff] %v5217_v27 }
 0x19e   : > { %2221 = vperm.xlu0 %3743, %v2197_v44  }
 0x19f   : > { %2147 = vmatmul.mubr.f32.gmra.mxu1 %v4448_v32  ;;  %v2193_v32 = vld [vmem:[%s5772_s6] sm:$0xff]  ;;  %v5232_v23 = vpop.permute.xlu0 %861 }
 0x1a0   : > { %2151 = vmatprep.mubr.f32.mxu1 %v4464_v43  ;;  %v1011_v34 = vpop.permute.xlu1 %1010 }
 0x1a1   : > { %3739 = vset.pattern.permute.xlu1 %v3770_v62 }
 0x1a2   : > { %2170 = vperm.xlu1 %3739, %v5106_v60   ;;  %2216 = vperm.xlu0 %3743, %v2196_v17   ;;  %v2194_v17 = vld [vmem:[%s5772_s6 + $0x8] sm:$0xff] }
 0x1a3   : > { %2152 = vmatmul.mubr.f32.gmra.mxu1 %v4480_v49  ;;  %v1015_v51 = vpop.permute.xlu0 %1014 }
 0x1a6   : > { %3740 = vset.pattern.permute.xlu1 %v3762_v1  ;;  %2211 = vperm.xlu0 %3743, %v2195_v2  }
 0x1a7   : > { %2226 = vperm.xlu1 %3740, %v2198_v33   ;;  %v3178_v43 = vpop.f32.mrf.mxu1  ;;  %v3228_v49 = vpop.f32.mrf.mxu0 }
 0x1a9   : > { %v3179_v28 = vpop.f32.mrf.mxu1  ;;  %v3229_v38 = vpop.f32.mrf.mxu0 }
 0x1aa   : > { %2201 = vperm.xlu0 %3743, %v2193_v32   ;;  %v3180_v39 = vadd.f32 %v3179_v28, %v3178_v43  ;;  %v3230_v41 = vadd.f32 %v3229_v38, %v3228_v49  ;;  %v2259_v28 = vld [vmem:[%s5774_s8] sm:$0xff] }
 0x1ab   : > { %3741 = vset.pattern.permute.xlu1 %v3769_v37 }
 0x1ac   : > { %1998 = vperm.xlu1 %3741, %v5206_v48   ;;  %v869_v45 = vmul.f32 %v3180_v39, %v842_v36  ;;  %v1033_v46 = vmul.f32 %v3230_v41, %v1011_v34  ;;  %v5284_v34 = vpop.permute.xlu0 %1194  ;;  %v2274_v39 = vld [vmem:[%s5774_s8 + $0x78] sm:$0xff] }
 0x1ad   : > { %v3181_v47 = vpop.f32.mrf.mxu1  ;;  %v3231_v22 = vpop.f32.mrf.mxu0 }
 0x1ae   : > { %2290 = vperm.xlu0 %3743, %v2260_v42   ;;  %v5239_v50 = vadd.f32 %v1033_v46, %v869_v45  ;;  %v2276_v46 = vld [vmem:[%s5774_s8 + $0x88] sm:$0xff] }
 0x1af   : > { %v3182_v53 = vpop.f32.mrf.mxu1  ;;  %v3232_v15 = vpop.f32.mrf.mxu0 }
 0x1b0   : > { %3742 = vset.pattern.permute.xlu1 %v3770_v62  ;;  %v3183_v57 = vadd.f32 %v3182_v53, %v3181_v47  ;;  %v3233_v58 = vadd.f32 %v3232_v15, %v3231_v22  ;;  %v1179_v45 = vpop.permute.xlu0 %1178  ;;  %v2263_v22 = vld [vmem:[%s5774_s8 + $0x20] sm:$0xff] }
 0x1b1   : > { %2166 = vperm.xlu1 %3742, %v5081_v55  }
 0x1b2   : > { %2300 = vperm.xlu0 %3743, %v2262_v52   ;;  %v870_v59 = vmul.f32 %v3183_v57, %v4974_v7  ;;  %v1034_v60 = vmul.f32 %v3233_v58, %v1015_v51  ;;  %v2266_v7 = vld [vmem:[%s5774_s8 + $0x38] sm:$0xff]  ;;  %v2265_v57 = vld [vmem:[%s5774_s8 + $0x30] sm:$0xff] }
 0x1b3   : > { %v3184_v12 = vpop.f32.mrf.mxu1  ;;  %v3234_v10 = vpop.f32.mrf.mxu0  ;;  %v2278_v52 = vld [vmem:[%s5774_s8 + $0x98] sm:$0xff] }
 0x1b4   : > { %v5250_v11 = vadd.f32 %v1034_v60, %v870_v59  ;;  %v5316_v15 = vpop.permute.xlu0 %1358  ;;  %v2280_v60 = vld [vmem:[%s5774_s8 + $0xa8] sm:$0xff] }
 0x1b5   : > { %3744 = vset.pattern.permute.xlu1 %v3769_v37  ;;  %v3185_v63 = vpop.f32.mrf.mxu1  ;;  %v3235_v3 = vpop.f32.mrf.mxu0 }
 0x1b6   : > { %1994 = vperm.xlu1 %3744, %v5053_v19   ;;  %2310 = vperm.xlu0 %3743, %v2264_v61   ;;  %v3186_v55 = vadd.f32 %v3185_v63, %v3184_v12  ;;  %v3236_v4 = vadd.f32 %v3235_v3, %v3234_v10  ;;  %v2267_v63 = vld [vmem:[%s5774_s8 + $0x40] sm:$0xff] }
 0x1b8   : > { %v871_v5 = vmul.f32 %v3186_v55, %v852_v54  ;;  %v1035_v8 = vmul.f32 %v3236_v4, %v5143_v6  ;;  %v5327_v4 = vpop.permute.xlu0 %1354 }
 0x1b9   : > { %v3187_v9 = vpop.f32.mrf.mxu1  ;;  %v3237_v14 = vpop.f32.mrf.mxu0 }
 0x1ba   : > { %3745 = vset.pattern.permute.xlu1 %v3770_v62  ;;  %2320 = vperm.xlu0 %3743, %v2266_v7   ;;  %v5259_v37 = vadd.f32 %v1035_v8, %v871_v5  ;;  %v2270_v62 = vld [vmem:[%s5774_s8 + $0x58] sm:$0xff] }
 0x1bb   : > { %2162 = vperm.xlu1 %3745, %v5206_v48   ;;  %v3188_v16 = vpop.f32.mrf.mxu1  ;;  %v3238_v30 = vpop.f32.mrf.mxu0  ;;  %v2282_v5 = vld [vmem:[%s5774_s8 + $0xb8] sm:$0xff] }
 0x1bc   : > { %v3189_v31 = vadd.f32 %v3188_v16, %v3187_v9  ;;  %v3239_v18 = vadd.f32 %v3238_v30, %v3237_v14  ;;  %v2269_v14 = vld [vmem:[%s5774_s8 + $0x50] sm:$0xff] }
 0x1be   : > { %2330 = vperm.xlu0 %3743, %v2268_v29   ;;  %v872_v6 = vmul.f32 %v3189_v31, %v5006_v20  ;;  %v1036_v36 = vmul.f32 %v3239_v18, %v5087_v56  ;;  %v2272_v56 = vld [vmem:[%s5774_s8 + $0x68] sm:$0xff] }
 0x1bf   : > { %2158 = vperm.xlu1 %3745, %v5053_v19   ;;  %v3190_v44 = vpop.f32.mrf.mxu1  ;;  %v3240_v48 = vpop.f32.mrf.mxu0 }
 0x1c0   : > { %v5271_v54 = vadd.f32 %v1036_v36, %v872_v6  ;;  %v5277_v19 = vpop.permute.xlu1 %1346  ;;  %v1343_v36 = vpop.permute.xlu0 %1342 }
 0x1c1   : > { %v3191_v2 = vpop.f32.mrf.mxu1  ;;  %v3241_v33 = vpop.f32.mrf.mxu0 }
 0x1c2   : > { %2340 = vperm.xlu0 %3743, %v2270_v62   ;;  %v3192_v20 = vadd.f32 %v3191_v2, %v3190_v44  ;;  %v3242_v32 = vadd.f32 %v3241_v33, %v3240_v48  ;;  %v2271_v62 = vld [vmem:[%s5774_s8 + $0x60] sm:$0xff] }
 0x1c3   : > { %3746 = vset.pattern.permute.xlu1 %v3762_v1 }
 0x1c4   : > { %2206 = vperm.xlu1 %3746, %v2194_v17   ;;  %v873_v43 = vmul.f32 %v3192_v20, %v5232_v23  ;;  %v1037_v49 = vmul.f32 %v3242_v32, %v5059_v21  ;;  %v2261_v21 = vld [vmem:[%s5774_s8 + $0x10] sm:$0xff]  ;;  %v5299_v23 = vpop.permute.xlu1 %1514 }
 0x1c5   : > { %v3193_v38 = vpop.f32.mrf.mxu1  ;;  %v5304_v47 = vpop.f32.mrf.mxu0  ;;  %v2273_v20 = vld [vmem:[%s5774_s8 + $0x70] sm:$0xff] }
 0x1c6   : > { %2350 = vperm.xlu0 %3743, %v2272_v56   ;;  %v5289_v1 = vadd.f32 %v1037_v49, %v873_v43 }
 0x1c7   : > { %v3194_v41 = vpop.f32.mrf.mxu1  ;;  %v5314_v53 = vpop.f32.mrf.mxu0 }
 0x1c8   : > { %2285 = vperm.xlu1 %3746, %v2259_v28   ;;  %v5294_v42 = vadd.f32 %v3194_v41, %v3193_v38  ;;  %v5309_v51 = vpop.permute.xlu1 %1850  ;;  %v2275_v28 = vld [vmem:[%s5774_s8 + $0x80] sm:$0xff] }
 0x1c9   : > { %5778 = vst [vmem:[#allocation3_spill] sm:$0xff] %v5309_v51 }
 0x1ca   : > { %2360 = vperm.xlu0 %3743, %v2274_v39  }
 0x1cc   : > { %2295 = vperm.xlu1 %3746, %v2261_v21   ;;  %v1175_v10 = vpop.permute.xlu1 %1174 }
 0x1ce   : > { %2370 = vperm.xlu0 %3743, %v2276_v46  }
 0x1d0   : > { %2305 = vperm.xlu1 %3746, %v2263_v22   ;;  %v5336_v31 = vpop.permute.xlu1 %1510 }
 0x1d2   : > { %2380 = vperm.xlu0 %3743, %v2278_v52   ;;  %v3278_v58 = vpop.f32.mrf.mxu1  ;;  %v3328_v59 = vpop.f32.mrf.mxu0 }
 0x1d4   : > { %2315 = vperm.xlu1 %3746, %v2265_v57   ;;  %v3279_v61 = vpop.f32.mrf.mxu1  ;;  %v3329_v12 = vpop.f32.mrf.mxu0 }
 0x1d5   : > { %v3280_v3 = vadd.f32 %v3279_v61, %v3278_v58  ;;  %v3330_v55 = vadd.f32 %v3329_v12, %v3328_v59  ;;  %v5342_v33 = vpop.permute.xlu1 %1678  ;;  %v2279_v58 = vld [vmem:[%s5774_s8 + $0xa0] sm:$0xff] }
 0x1d6   : > { %2390 = vperm.xlu0 %3743, %v2280_v60   ;;  %5779 = vst [vmem:[#allocation4_spill] sm:$0xff] %v5342_v33 }
 0x1d7   : > { %v1197_v7 = vmul.f32 %v3280_v3, %v1175_v10 }
 0x1d8   : > { %2325 = vperm.xlu1 %3746, %v2267_v63   ;;  %v3281_v8 = vpop.f32.mrf.mxu1  ;;  %v3331_v9 = vpop.f32.mrf.mxu0 }
 0x1d9   : > { %v1203_v29 = vadd.f32 %v1197_v7, %v5239_v50 }
 0x1da   : > { %2400 = vperm.xlu0 %3743, %v2282_v5   ;;  %v3282_v16 = vpop.f32.mrf.mxu1  ;;  %v3332_v30 = vpop.f32.mrf.mxu0 }
 0x1db   : > { %v3283_v18 = vadd.f32 %v3282_v16, %v3281_v8  ;;  %v3333_v6 = vadd.f32 %v3332_v30, %v3331_v9 }
 0x1dc   : > { %2335 = vperm.xlu1 %3746, %v2269_v14  }
 0x1dd   : > { %v1198_v44 = vmul.f32 %v3283_v18, %v1179_v45  ;;  %v1362_v2 = vmul.f32 %v3333_v6, %v1343_v36  ;;  %v5405_v6 = vpop.permute.xlu0 %1518 }
 0x1de   : > { %v3284_v48 = vpop.f32.mrf.mxu1  ;;  %v5356_v41 = vpop.f32.mrf.mxu0 }
 0x1df   : > { %v1204_v17 = vadd.f32 %v1198_v44, %v5250_v11 }
 0x1e0   : > { %2345 = vperm.xlu1 %3746, %v2271_v62   ;;  %v3285_v50 = vpop.f32.mrf.mxu1  ;;  %v5362_v22 = vpop.f32.mrf.mxu0 }
 0x1e1   : > { %v1368_v32 = vadd.f32 %v1362_v2, %v1204_v17  ;;  %v3286_v56 = vadd.f32 %v3285_v50, %v3284_v48 }
 0x1e3   : > { %v1199_v43 = vmul.f32 %v3286_v56, %v5188_v35  ;;  %v2277_v35 = vld [vmem:[%s5774_s8 + $0x90] sm:$0xff]  ;;  %v1507_v56 = vpop.permute.xlu0 %1506 }
 0x1e4   : > { %2355 = vperm.xlu1 %3746, %v2273_v20   ;;  %v3287_v49 = vpop.f32.mrf.mxu1  ;;  %v5370_v61 = vpop.f32.mrf.mxu0 }
 0x1e5   : > { %v5352_v11 = vadd.f32 %v1199_v43, %v5259_v37 }
 0x1e6   : > { %v3288_v38 = vpop.f32.mrf.mxu1  ;;  %v5381_v3 = vpop.f32.mrf.mxu0 }
 0x1e7   : > { %v5354_v39 = vpop.permute.xlu1 %2014  ;;  %v3289_v21 = vadd.f32 %v3288_v38, %v3287_v49 }
 0x1e8   : > { %5780 = vst [vmem:[#allocation5_spill] sm:$0xff] %v5354_v39  ;;  %2365 = vperm.xlu1 %3746, %v2275_v28   ;;  %v5459_v39 = vpop.permute.xlu0 %1682 }
 0x1e9   : > { %v1200_v45 = vmul.f32 %v3289_v21, %v5170_v40  ;;  %5794 = vst [vmem:[#allocation19_spill] sm:$0xff] %v5459_v39 }
 0x1ea   : > { %v3290_v46 = vpop.f32.mrf.mxu1  ;;  %v5383_v7 = vpop.f32.mrf.mxu0 }
 0x1eb   : > { %v5365_v52 = vadd.f32 %v1200_v45, %v5271_v54  ;;  %v2281_v54 = vld [vmem:[%s5774_s8 + $0xb0] sm:$0xff] }
 0x1ec   : > { %2375 = vperm.xlu1 %3746, %v2277_v35   ;;  %v3291_v37 = vpop.f32.mrf.mxu1  ;;  %v5397_v8 = vpop.f32.mrf.mxu0 }
 0x1ed   : > { %v1339_v57 = vpop.permute.xlu1 %1338  ;;  %v3292_v59 = vadd.f32 %v3291_v37, %v3290_v46  ;;  %v1671_v51 = vpop.permute.xlu0 %1670 }
 0x1ee   : > { %v1361_v60 = vmul.f32 %v3330_v55, %v1339_v57 }
 0x1ef   : > { %v1201_v12 = vmul.f32 %v3292_v59, %v5117_v13  ;;  %v2235_v13 = vld [vmem:[%s5773_s7] sm:$0xff] }
 0x1f0   : > { %v1367_v40 = vadd.f32 %v1361_v60, %v1203_v29  ;;  %2385 = vperm.xlu1 %3746, %v2279_v58   ;;  %v5385_v55 = vpop.f32.mrf.mxu1  ;;  %3638 = vmatprep.mubr.msk.f32.mxu0 %vm574_vm0, %v2235_v13  ;;  %v5403_v16 = vpop.f32.mrf.mxu0 }
 0x1f1   : > { %v5377_v10 = vadd.f32 %v1201_v12, %v5289_v1  ;;  %v2251_v1 = vld [vmem:[%s5773_s7 + $0x80] sm:$0xff] }
 0x1f2   : > { %3662 = vmatprep.mubr.msk.f32.mxu1 %vm574_vm0, %v2251_v1  ;;  %v5399_v9 = vpop.f32.mrf.mxu1  ;;  %v5407_v36 = vpop.f32.mrf.mxu0 }
 0x1f3   : > { %v5379_v63 = vpop.permute.xlu1 %1674 }
 0x1f4   : > { %2395 = vperm.xlu1 %3746, %v2281_v54  }
 0x1f8   : > { %v5387_v5 = vpop.permute.xlu1 %1842 }
 0x1f9   : > { %5781 = vst [vmem:[#allocation6_spill] sm:$0xff] %v5387_v5 }
 0x1fe   : > { %v3378_v14 = vpop.f32.mrf.mxu1  ;;  %v5409_v48 = vpop.f32.mrf.mxu0 }
 0x1ff   : > { %v5401_v29 = vpop.permute.xlu1 %2178 }
 0x200   : > { %5782 = vst [vmem:[#allocation7_spill] sm:$0xff] %v5401_v29  ;;  %v3379_v30 = vpop.f32.mrf.mxu1  ;;  %v5413_v43 = vpop.f32.mrf.mxu0 }
 0x201   : > { %v3380_v18 = vadd.f32 %v3379_v30, %v3378_v14 }
 0x204   : > { %v1503_v62 = vpop.permute.xlu1 %1502  ;;  %v3381_v44 = vpop.f32.mrf.mxu1 }
 0x205   : > { %v1525_v17 = vmul.f32 %v3380_v18, %v1503_v62  ;;  %v5417_v21 = vpop.f32.mrf.mxu0 }
 0x206   : > { %v3382_v2 = vpop.f32.mrf.mxu1 }
 0x207   : > { %v5411_v50 = vadd.f32 %v1525_v17, %v1367_v40  ;;  %v3383_v20 = vadd.f32 %v3382_v2, %v3381_v44  ;;  %v5419_v45 = vpop.f32.mrf.mxu0 }
 0x209   : > { %5783 = vst [vmem:[#allocation8_spill] sm:$0xff] %v5411_v50  ;;  %v1526_v49 = vmul.f32 %v3383_v20, %v1507_v56  ;;  %v5453_v56 = vpop.permute.xlu1 %1838 }
 0x20a   : > { %v3384_v38 = vpop.f32.mrf.mxu1  ;;  %v5423_v37 = vpop.f32.mrf.mxu0  ;;  %5791 = vst [vmem:[#allocation16_spill] sm:$0xff] %v5453_v56 }
 0x20b   : > { %v5415_v28 = vadd.f32 %v1526_v49, %v1368_v32 }
 0x20c   : > { %v3385_v35 = vpop.f32.mrf.mxu1  ;;  %v5427_v58 = vpop.f32.mrf.mxu0 }
 0x20d   : > { %5784 = vst [vmem:[#allocation9_spill] sm:$0xff] %v5415_v28 }
 0x20e   : > { %v5463_v5 = vpop.permute.xlu1 %2006 }
 0x20f   : > { %5795 = vst [vmem:[#allocation20_spill] sm:$0xff] %v5463_v5 }
 0x210   : > { %v5421_v46 = vpop.f32.mrf.mxu1  ;;  %v5429_v60 = vpop.f32.mrf.mxu0 }
 0x212   : > { %v5425_v57 = vpop.f32.mrf.mxu1  ;;  %v5431_v32 = vpop.f32.mrf.mxu0 }
 0x216   : > { %v3390_v59 = vpop.f32.mrf.mxu1  ;;  %v5433_v54 = vpop.f32.mrf.mxu0 }
 0x218   : > { %v3391_v12 = vpop.f32.mrf.mxu1  ;;  %v5435_v1 = vpop.f32.mrf.mxu0 }
 0x21c   : > { %v3393_v40 = vpop.f32.mrf.mxu1  ;;  %v5441_v18 = vpop.f32.mrf.mxu0 }
 0x21e   : > { %v3394_v13 = vpop.f32.mrf.mxu1  ;;  %v5447_v17 = vpop.f32.mrf.mxu0 }
 0x22a   : > { %v5437_v14 = vpop.f32.mrf.mxu1 }
 0x22b   : > { %5785 = vst [vmem:[#allocation10_spill] sm:$0xff] %v5437_v14  ;;  %v5449_v2 = vpop.f32.mrf.mxu0 }
 0x22c   : > { %v5439_v30 = vpop.f32.mrf.mxu1  ;;  %5789 = vst [vmem:[#allocation14_spill] sm:$0xff] %v5449_v2 }
 0x22d   : > { %5786 = vst [vmem:[#allocation11_spill] sm:$0xff] %v5439_v30  ;;  %v5457_v29 = vpop.f32.mrf.mxu0  ;;  %v5471_v30 = vpop.permute.xlu1 %1666 }
 0x22e   : > { %v5443_v62 = vpop.f32.mrf.mxu1  ;;  %5793 = vst [vmem:[#allocation18_spill] sm:$0xff] %v5457_v29  ;;  %5798 = vst [vmem:[#allocation23_spill] sm:$0xff] %v5471_v30  ;;  %v5477_v29 = vpop.permute.xlu0 %2174 }
 0x22f   : > { %5787 = vst [vmem:[#allocation12_spill] sm:$0xff] %v5443_v62  ;;  %v5465_v62 = vpop.f32.mrf.mxu0  ;;  %5801 = vst [vmem:[#allocation26_spill] sm:$0xff] %v5477_v29 }
 0x230   : > { %v5445_v44 = vpop.f32.mrf.mxu1  ;;  %5796 = vst [vmem:[#allocation21_spill] sm:$0xff] %v5465_v62 }
 0x231   : > { %5788 = vst [vmem:[#allocation13_spill] sm:$0xff] %v5445_v44  ;;  %v5469_v2 = vpop.f32.mrf.mxu0  ;;  %v5475_v27 = vpop.permute.xlu1 %1834 }
 0x232   : > { %5797 = vst [vmem:[#allocation22_spill] sm:$0xff] %v5469_v2  ;;  %5800 = vst [vmem:[#allocation25_spill] sm:$0xff] %v5475_v27  ;;  %v5483_v62 = vpop.permute.xlu0 %2010  ;;  %v3245_v2 = vadd.f32 %v5314_v53, %v5304_v47  ;;  %v3336_v47 = vadd.f32 %v5362_v22, %v5356_v41 }
 0x233   : > { %v5451_v20 = vpop.f32.mrf.mxu1  ;;  %5804 = vst [vmem:[#allocation29_spill] sm:$0xff] %v5483_v62 }
 0x234   : > { %5790 = vst [vmem:[#allocation15_spill] sm:$0xff] %v5451_v20  ;;  %v5473_v14 = vpop.f32.mrf.mxu0  ;;  %v1363_v41 = vmul.f32 %v3336_v47, %v5277_v19  ;;  %v5810_v47 = vld [vmem:[#allocation19_spill] sm:$0xff] }
 0x235   : > { %v5455_v49 = vpop.f32.mrf.mxu1  ;;  %5799 = vst [vmem:[#allocation24_spill] sm:$0xff] %v5473_v14  ;;  %v5481_v20 = vpop.permute.xlu1 %2170  ;;  %v3295_v14 = vadd.f32 %v5399_v9, %v5385_v55  ;;  %v3386_v55 = vadd.f32 %v3385_v35, %v3384_v38  ;;  %v3395_v38 = vadd.f32 %v3394_v13, %v3393_v40 }
 0x236   : > { %5792 = vst [vmem:[#allocation17_spill] sm:$0xff] %v5455_v49  ;;  %v5479_v49 = vpop.f32.mrf.mxu0  ;;  %5803 = vst [vmem:[#allocation28_spill] sm:$0xff] %v5481_v20  ;;  %v1038_v20 = vmul.f32 %v3245_v2, %v5030_v25  ;;  %v5500_v62 = vpop.permute.xlu0 %2002  ;;  %v3345_v25 = vadd.f32 %v5407_v36, %v5403_v16  ;;  %v3392_v2 = vadd.f32 %v3391_v12, %v3390_v59 }
 0x237   : > { %5802 = vst [vmem:[#allocation27_spill] sm:$0xff] %v5479_v49  ;;  %v874_v49 = vmul.f32 %v5294_v42, %v5223_v0  ;;  %v1202_v53 = vmul.f32 %v3295_v14, %v5284_v34  ;;  %v3342_v0 = vadd.f32 %v5397_v8, %v5383_v7  ;;  %v3339_v42 = vadd.f32 %v5381_v3, %v5370_v61 }
 0x238   : > { %v1527_v22 = vmul.f32 %v3386_v55, %v5336_v31  ;;  %v3433_v7 = vadd.f32 %v5419_v45, %v5417_v21  ;;  %v3389_v8 = vadd.f32 %v5425_v57, %v5421_v46  ;;  %v1369_v3 = vadd.f32 %v1363_v41, %v5352_v11 }
 0x239   : > { %v5461_v50 = vpop.f32.mrf.mxu1  ;;  %v5485_v39 = vpop.f32.mrf.mxu0  ;;  %v1365_v19 = vmul.f32 %v3342_v0, %v5327_v4  ;;  %v3436_v31 = vadd.f32 %v5427_v58, %v5423_v37  ;;  %v1364_v36 = vmul.f32 %v3339_v42, %v5201_v26  ;;  %v1529_v59 = vmul.f32 %v3392_v2, %v5405_v6  ;;  %v5813_v0 = vld [vmem:[#allocation4_spill] sm:$0xff]  ;;  %v5815_v42 = vld [vmem:[#allocation10_spill] sm:$0xff]  ;;  %v5816_v2 = vld [vmem:[#allocation11_spill] sm:$0xff] }
 0x23a   : > { %5805 = vst [vmem:[#allocation30_spill] sm:$0xff] %v5485_v39  ;;  %v5498_v28 = vpop.permute.xlu1 %2226  ;;  %v1847_v14 = vpop.permute.xlu0 %1846  ;;  %v1533_v57 = vadd.f32 %v1527_v22, %v1369_v3  ;;  %v1530_v12 = vmul.f32 %v3395_v38, %v5181_v24  ;;  %v1690_v40 = vmul.f32 %v3433_v7, %v1671_v51  ;;  %v1528_v11 = vmul.f32 %v3389_v8, %v5299_v23  ;;  %v5818_v22 = vld [vmem:[#allocation12_spill] sm:$0xff]  ;;  %v5819_v38 = vld [vmem:[#allocation13_spill] sm:$0xff]  ;;  %v5820_v8 = vld [vmem:[#allocation6_spill] sm:$0xff] }
 0x23b   : > { %v5467_v44 = vpop.f32.mrf.mxu1  ;;  %v5491_v27 = vpop.f32.mrf.mxu0  ;;  %5808 = vst [vmem:[#allocation33_spill] sm:$0xff] %v5498_v28  ;;  %v1371_v45 = vadd.f32 %v1365_v19, %v5377_v10  ;;  %v1691_v26 = vmul.f32 %v3436_v31, %v5379_v63  ;;  %v3439_v6 = vadd.f32 %v5431_v32, %v5429_v60  ;;  %v3445_v10 = vadd.f32 %v5447_v17, %v5441_v18  ;;  %v5809_v63 = vld [vmem:[#allocation9_spill] sm:$0xff]  ;;  %v5811_v17 = vld [vmem:[#allocation15_spill] sm:$0xff] }
 0x23c   : > { %5806 = vst [vmem:[#allocation31_spill] sm:$0xff] %v5491_v27  ;;  %v1370_v24 = vadd.f32 %v1364_v36, %v5365_v52  ;;  %v3483_v7 = vadd.f32 %v5819_v38, %v5818_v22  ;;  %v5836_v22 = vld [vmem:[#allocation7_spill] sm:$0xff] }
 0x23d   : > { %v1535_v51 = vadd.f32 %v1529_v59, %v1371_v45 }
 0x23e   : > { %v3490_v56 = vpop.f32.mrf.mxu1  ;;  %v3540_v9 = vpop.f32.mrf.mxu0  ;;  %v1534_v32 = vadd.f32 %v1528_v11, %v1370_v24 }
 0x23f   : > { %v5519_v35 = vpop.permute.xlu1 %1998  ;;  %v1831_v58 = vpop.permute.xlu0 %1830 }
 0x240   : > { %v3491_v33 = vpop.f32.mrf.mxu1  ;;  %v3541_v16 = vpop.f32.mrf.mxu0 }
 0x241   : > { %v3492_v4 = vadd.f32 %v3491_v33, %v3490_v56  ;;  %v1696_v56 = vadd.f32 %v1690_v40, %v5809_v63  ;;  %v3542_v19 = vadd.f32 %v3541_v16, %v3540_v9  ;;  %v5822_v40 = vld [vmem:[#allocation16_spill] sm:$0xff] }
 0x242   : > { %v3543_v13 = vpop.f32.mrf.mxu0  ;;  %v5827_v63 = vld [vmem:[#allocation24_spill] sm:$0xff] }
 0x243   : > { %v3493_v5 = vpop.f32.mrf.mxu1  ;;  %v2167_v23 = vpop.permute.xlu1 %2166  ;;  %v1857_v52 = vmul.f32 %v3492_v4, %v1847_v14  ;;  %v5821_v14 = vld [vmem:[#allocation23_spill] sm:$0xff] }
 0x244   : > { %v2222_v59 = vpop.permute.xlu0 %2221  ;;  %v5824_v4 = vld [vmem:[#allocation31_spill] sm:$0xff] }
 0x245   : > { %v3494_v30 = vpop.f32.mrf.mxu1 }
 0x24f   : > { %v5493_v29 = vpop.f32.mrf.mxu1 }
 0x250   : > { %5807 = vst [vmem:[#allocation32_spill] sm:$0xff] %v5493_v29  ;;  %v1044_v29 = vadd.f32 %v1038_v20, %v874_v49  ;;  %v3495_v20 = vadd.f32 %v3494_v30, %v3493_v5  ;;  %v1697_v49 = vadd.f32 %v1691_v26, %v1533_v57  ;;  %v5812_v5 = vld [vmem:[#allocation17_spill] sm:$0xff] }
 0x251   : > { %v5502_v39 = vpop.f32.mrf.mxu1  ;;  %v3486_v30 = vadd.f32 %v5812_v5, %v5811_v17  ;;  %v5830_v5 = vld [vmem:[#allocation5_spill] sm:$0xff] }
 0x252   : > { %v1208_v34 = vadd.f32 %v1202_v53, %v1044_v29  ;;  %v1366_v29 = vmul.f32 %v3345_v25, %v5316_v15  ;;  %v3442_v15 = vadd.f32 %v5435_v1, %v5433_v54  ;;  %v3489_v54 = vadd.f32 %v5467_v44, %v5461_v50  ;;  %v3544_v53 = vpop.f32.mrf.mxu0  ;;  %v5814_v50 = vld [vmem:[#allocation2_spill] sm:$0xff] }
 0x253   : > { %v5507_v27 = vpop.f32.mrf.mxu1  ;;  %v3430_v1 = vadd.f32 %v5413_v43, %v5409_v48  ;;  %v1692_v25 = vmul.f32 %v3439_v6, %v5813_v0  ;;  %v1694_v44 = vmul.f32 %v3445_v10, %v5814_v50  ;;  %v3480_v48 = vadd.f32 %v5816_v2, %v5815_v42  ;;  %v5817_v43 = vld [vmem:[#allocation3_spill] sm:$0xff] }
 0x254   : > { %v1372_v46 = vadd.f32 %v1366_v29, %v1208_v34  ;;  %v1693_v18 = vmul.f32 %v3442_v15, %v5810_v47  ;;  %v1858_v41 = vmul.f32 %v3495_v20, %v5817_v43  ;;  %v1856_v3 = vmul.f32 %v3489_v54, %v5820_v8  ;;  %v5823_v15 = vld [vmem:[#allocation30_spill] sm:$0xff]  ;;  %v5825_v20 = vld [vmem:[#allocation8_spill] sm:$0xff]  ;;  %v5826_v54 = vld [vmem:[#allocation25_spill] sm:$0xff] }
 0x255   : > { %v5515_v28 = vpop.f32.mrf.mxu1  ;;  %v1689_v31 = vmul.f32 %v3430_v1, %v5821_v14  ;;  %v3545_v45 = vadd.f32 %v3544_v53, %v3543_v13  ;;  %v1698_v57 = vadd.f32 %v1692_v25, %v1534_v32  ;;  %v1855_v11 = vmul.f32 %v3486_v30, %v5822_v40  ;;  %v5829_v32 = vld [vmem:[#allocation29_spill] sm:$0xff] }
 0x256   : > { %v1536_v60 = vadd.f32 %v1530_v12, %v1372_v46  ;;  %v1699_v34 = vadd.f32 %v1693_v18, %v1535_v51  ;;  %v1995_v12 = vpop.permute.xlu1 %1994  ;;  %v3539_v26 = vadd.f32 %v5824_v4, %v5823_v15  ;;  %v1853_v51 = vmul.f32 %v3480_v48, %v1831_v58  ;;  %v5832_v25 = vld [vmem:[#allocation21_spill] sm:$0xff]  ;;  %v5833_v58 = vld [vmem:[#allocation22_spill] sm:$0xff] }
 0x257   : > { %v5525_v61 = vpop.f32.mrf.mxu1  ;;  %v1695_v24 = vadd.f32 %v1689_v31, %v5825_v20  ;;  %v1854_v1 = vmul.f32 %v3483_v7, %v5826_v54  ;;  %v1862_v47 = vadd.f32 %v1856_v3, %v1698_v57  ;;  %v2021_v18 = vmul.f32 %v3542_v19, %v5829_v32  ;;  %v2217_v3 = vpop.permute.xlu0 %2216  ;;  %v2236_v54 = vld [vmem:[%s5773_s7 + $0x8] sm:$0xff]  ;;  %v2239_v32 = vld [vmem:[%s5773_s7 + $0x20] sm:$0xff] }
 0x258   : > { %v1700_v36 = vadd.f32 %v1694_v44, %v1536_v60  ;;  %v1863_v6 = vadd.f32 %v1857_v52, %v1699_v34  ;;  %v5828_v60 = vld [vmem:[#allocation27_spill] sm:$0xff]  ;;  %v2022_v30 = vmul.f32 %v3545_v45, %v5830_v5  ;;  %v5831_v52 = vld [vmem:[#allocation26_spill] sm:$0xff]  ;;  %v3533_v50 = vadd.f32 %v5833_v58, %v5832_v25  ;;  %v2245_v58 = vld [vmem:[%s5773_s7 + $0x50] sm:$0xff] }
 0x259   : > { %v3585_v21 = vpop.f32.mrf.mxu1  ;;  %v3536_v13 = vadd.f32 %v5828_v60, %v5827_v63  ;;  %v3583_v43 = vadd.f32 %v5515_v28, %v5507_v27  ;;  %v1860_v8 = vadd.f32 %v1854_v1, %v1696_v56  ;;  %v2252_v1 = vld [vmem:[%s5773_s7 + $0x88] sm:$0xff]  ;;  %v2237_v63 = vld [vmem:[%s5773_s7 + $0x10] sm:$0xff] }
 0x25a   : > { %v1864_v9 = vadd.f32 %v1858_v41, %v1700_v36  ;;  %v3586_v53 = vadd.f32 %v3585_v21, %v5525_v61  ;;  %v2027_v42 = vadd.f32 %v2021_v18, %v1863_v6  ;;  %v2163_v2 = vpop.permute.xlu1 %2162  ;;  %v5835_v41 = vld [vmem:[#allocation28_spill] sm:$0xff]  ;;  %v5837_v61 = vld [vmem:[#allocation14_spill] sm:$0xff]  ;;  %v2018_v27 = vmul.f32 %v3533_v50, %v5519_v35  ;;  %v2256_v5 = vld [vmem:[%s5773_s7 + $0xa8] sm:$0xff] }
 0x25b   : > { %v3587_v37 = vpop.f32.mrf.mxu1  ;;  %v5838_v21 = vld [vmem:[#allocation18_spill] sm:$0xff]  ;;  %v2019_v19 = vmul.f32 %v3536_v13, %v5500_v62  ;;  %v2182_v57 = vmul.f32 %v3583_v43, %v2163_v2  ;;  %v2253_v60 = vld [vmem:[%s5773_s7 + $0x90] sm:$0xff]  ;;  %v2238_v13 = vld [vmem:[%s5773_s7 + $0x18] sm:$0xff] }
 0x25c   : > { %v2028_v48 = vadd.f32 %v2022_v30, %v1864_v9  ;;  %v3530_v7 = vadd.f32 %v5838_v21, %v5837_v61  ;;  %v2183_v31 = vmul.f32 %v3586_v53, %v2167_v23  ;;  %v2024_v56 = vadd.f32 %v2018_v27, %v1860_v8  ;;  %v2255_v18 = vld [vmem:[%s5773_s7 + $0xa0] sm:$0xff]  ;;  %v2241_v30 = vld [vmem:[%s5773_s7 + $0x30] sm:$0xff]  ;;  %v2244_v25 = vld [vmem:[%s5773_s7 + $0x48] sm:$0xff] }
 0x25d   : > { %v3588_v33 = vpop.f32.mrf.mxu1  ;;  %v2257_v53 = vld [vmem:[%s5773_s7 + $0xb0] sm:$0xff]  ;;  %v2246_v50 = vld [vmem:[%s5773_s7 + $0x58] sm:$0xff] }
 0x25e   : > { %v3589_v16 = vadd.f32 %v3588_v33, %v3587_v37  ;;  %v1861_v37 = vadd.f32 %v1855_v11, %v1697_v49  ;;  %v5834_v33 = vld [vmem:[#allocation20_spill] sm:$0xff]  ;;  %v5840_v11 = vld [vmem:[#allocation33_spill] sm:$0xff]  ;;  %v2017_v4 = vmul.f32 %v3530_v7, %v1995_v12  ;;  %v2188_v20 = vadd.f32 %v2182_v57, %v2024_v56 }
 0x25f   : > { %v3590_v55 = vpop.f32.mrf.mxu1  ;;  %v2020_v44 = vmul.f32 %v3539_v26, %v5834_v33  ;;  %v2159_v26 = vpop.permute.xlu1 %2158  ;;  %v2248_v33 = vld [vmem:[%s5773_s7 + $0x68] sm:$0xff] }
 0x260   : > { %v2184_v34 = vmul.f32 %v3589_v16, %v5835_v41  ;;  %v2025_v28 = vadd.f32 %v2019_v19, %v1861_v37  ;;  %v2247_v37 = vld [vmem:[%s5773_s7 + $0x60] sm:$0xff] }
 0x261   : > { %v3591_v29 = vpop.f32.mrf.mxu1  ;;  %v2026_v49 = vadd.f32 %v2020_v44, %v1862_v47  ;;  %v2254_v47 = vld [vmem:[%s5773_s7 + $0x98] sm:$0xff]  ;;  %v2249_v44 = vld [vmem:[%s5773_s7 + $0x70] sm:$0xff] }
 0x262   : > { %v3592_v46 = vadd.f32 %v3591_v29, %v3590_v55  ;;  %v5839_v29 = vld [vmem:[#allocation32_spill] sm:$0xff]  ;;  %v2189_v62 = vadd.f32 %v2183_v31, %v2025_v28 }
 0x263   : > { %v3593_v10 = vpop.f32.mrf.mxu1  ;;  %v3580_v14 = vadd.f32 %v5502_v39, %v5839_v29  ;;  %v2190_v40 = vadd.f32 %v2184_v34, %v2026_v49  ;;  %v2212_v39 = vpop.permute.xlu0 %2211 }
 0x264   : > { %v2185_v55 = vmul.f32 %v3592_v46, %v5831_v52  ;;  %v1859_v46 = vadd.f32 %v1853_v51, %v1695_v24  ;;  %v2231_v51 = vadd.f32 %v2212_v39, %v2189_v62  ;;  %v2207_v12 = vpop.permute.xlu1 %2206  ;;  %v2242_v52 = vld [vmem:[%s5773_s7 + $0x38] sm:$0xff] }
 0x265   : > { %v3594_v17 = vpop.f32.mrf.mxu1  ;;  %v2181_v6 = vmul.f32 %v3580_v14, %v2159_v26  ;;  %v2232_v24 = vadd.f32 %v2217_v3, %v2190_v40 }
 0x266   : > { %v3595_v0 = vadd.f32 %v3594_v17, %v3593_v10  ;;  %v2191_v36 = vadd.f32 %v2185_v55, %v2027_v42  ;;  %v2023_v23 = vadd.f32 %v2017_v4, %v1859_v46  ;;  %v2240_v17 = vld [vmem:[%s5773_s7 + $0x28] sm:$0xff]  ;;  %v2258_v55 = vld [vmem:[%s5773_s7 + $0xb8] sm:$0xff] }
 0x267   : > { %v2202_v9 = vpop.permute.xlu0 %2201  ;;  %v2250_v42 = vld [vmem:[%s5773_s7 + $0x78] sm:$0xff] }
 0x268   : > { %v2186_v38 = vmul.f32 %v3595_v0, %v5836_v22  ;;  %v2233_v10 = vadd.f32 %v2222_v59, %v2191_v36  ;;  %v2187_v35 = vadd.f32 %v2181_v6, %v2023_v23  ;;  %v2230_v59 = vadd.f32 %v2207_v12, %v2188_v20  ;;  %v2243_v0 = vld [vmem:[%s5773_s7 + $0x40] sm:$0xff] }
 0x26a   : > { %v2192_v45 = vadd.f32 %v2186_v38, %v2028_v48  ;;  %v2229_v16 = vadd.f32 %v2202_v9, %v2187_v35  ;;  %v2286_v48 = vpop.permute.xlu1 %2285 }
 0x26b   : > { %v2291_v2 = vpop.permute.xlu0 %2290 }
 0x26c   : > { %v2234_v15 = vadd.f32 %v5840_v11, %v2192_v45 }
 0x26e   : > { %3626 = vmatprep.subr.mxu0 %v2234_v15  ;;  %3674 = vmatprep.subr.mxu1 %v2234_v15  ;;  %v2296_v41 = vpop.permute.xlu1 %2295 }
 0x26f   : > { %3627 = vmatpush3.msra.mxu0 %v2234_v15  ;;  %3680 = vmatpush3.msra.mxu1 %v2234_v15  ;;  %v2301_v43 = vpop.permute.xlu0 %2300 }
 0x270   : > { %3628 = vmatprep.subr.mxu0 %v2233_v10  ;;  %3675 = vmatprep.subr.mxu1 %v2233_v10 }
 0x271   : > { %3629 = vmatpush3.msra.mxu0 %v2233_v10  ;;  %3681 = vmatpush3.msra.mxu1 %v2233_v10 }
 0x272   : > { %3630 = vmatprep.subr.mxu0 %v2232_v24  ;;  %3676 = vmatprep.subr.mxu1 %v2232_v24  ;;  %v5675_v22 = vpop.permute.xlu1 %2305 }
 0x273   : > { %3631 = vmatpush3.msra.mxu0 %v2232_v24  ;;  %3682 = vmatpush3.msra.mxu1 %v2232_v24  ;;  %v2311_v34 = vpop.permute.xlu0 %2310 }
 0x274   : > { %3632 = vmatprep.subr.mxu0 %v2231_v51  ;;  %3677 = vmatprep.subr.mxu1 %v2231_v51 }
 0x275   : > { %3633 = vmatpush3.msra.mxu0 %v2231_v51  ;;  %3683 = vmatpush3.msra.mxu1 %v2231_v51 }
 0x276   : > { %3634 = vmatprep.subr.mxu0 %v2230_v59  ;;  %3678 = vmatprep.subr.mxu1 %v2230_v59  ;;  %v5679_v61 = vpop.permute.xlu1 %2315 }
 0x277   : > { %3635 = vmatpush3.msra.mxu0 %v2230_v59  ;;  %3684 = vmatpush3.msra.mxu1 %v2230_v59  ;;  %v5677_v38 = vpop.permute.xlu0 %2320 }
 0x278   : > { %3636 = vmatprep.subr.mxu0 %v2229_v16  ;;  %3679 = vmatprep.subr.mxu1 %v2229_v16 }
 0x279   : > { %3637 = vmatpush3.msra.mxu0 %v2229_v16  ;;  %3685 = vmatpush3.msra.mxu1 %v2229_v16 }
 0x27a   : > { %3639 = vmatmul.mubr.msk.f32.vlgmr.msra.gmra.mxu0 %vm574_vm0, %v2236_v54  ;;  %3663 = vmatmul.mubr.msk.f32.vlgmr.msra.gmra.mxu1 %vm574_vm0, %v2252_v1  ;;  %v5683_v7 = vpop.permute.xlu1 %2325 }
 0x27b   : > { %3641 = vmatprep.mubr.msk.f32.mxu0 %vm574_vm0, %v2237_v63  ;;  %3665 = vmatprep.mubr.msk.f32.mxu1 %vm574_vm0, %v2253_v60  ;;  %v5681_v21 = vpop.permute.xlu0 %2330 }
 0x27e   : > { %3642 = vmatmul.mubr.msk.f32.gmra.mxu0 %vm574_vm0, %v2238_v13  ;;  %3666 = vmatmul.mubr.msk.f32.gmra.mxu1 %vm574_vm0, %v2254_v47  ;;  %v5687_v3 = vpop.permute.xlu1 %2335 }
 0x27f   : > { %3644 = vmatprep.mubr.msk.f32.mxu0 %vm574_vm0, %v2239_v32  ;;  %3668 = vmatprep.mubr.msk.f32.mxu1 %vm574_vm0, %v2255_v18  ;;  %v5685_v8 = vpop.permute.xlu0 %2340 }
 0x282   : > { %3645 = vmatmul.mubr.msk.f32.gmra.mxu0 %vm574_vm0, %v2240_v17  ;;  %3669 = vmatmul.mubr.msk.f32.gmra.mxu1 %vm574_vm0, %v2256_v5  ;;  %v5691_v49 = vpop.permute.xlu1 %2345 }
 0x283   : > { %3647 = vmatprep.mubr.msk.f32.mxu0 %vm574_vm0, %v2241_v30  ;;  %3671 = vmatprep.mubr.msk.f32.mxu1 %vm574_vm0, %v2257_v53  ;;  %v5689_v19 = vpop.permute.xlu0 %2350 }
 0x286   : > { %3648 = vmatmul.mubr.msk.f32.gmra.mxu0 %vm574_vm0, %v2242_v52  ;;  %3672 = vmatmul.mubr.msk.f32.gmra.mxu1 %vm574_vm0, %v2258_v55  ;;  %v5697_v14 = vpop.permute.xlu1 %2355 }
 0x287   : > { %3650 = vmatprep.mubr.msk.f32.mxu0 %vm574_vm0, %v2243_v0  ;;  %v5693_v29 = vpop.permute.xlu0 %2360 }
 0x28a   : > { %3651 = vmatmul.mubr.msk.f32.gmra.mxu0 %vm574_vm0, %v2244_v25  ;;  %v2366_v36 = vpop.permute.xlu1 %2365 }
 0x28b   : > { %3653 = vmatprep.mubr.msk.f32.mxu0 %vm574_vm0, %v2245_v58  ;;  %v2371_v31 = vpop.permute.xlu0 %2370 }
 0x28e   : > { %3654 = vmatmul.mubr.msk.f32.gmra.mxu0 %vm574_vm0, %v2246_v50  ;;  %v2376_v28 = vpop.permute.xlu1 %2375 }
 0x28f   : > { %3656 = vmatprep.mubr.msk.f32.mxu0 %vm574_vm0, %v2247_v37  ;;  %v2381_v45 = vpop.permute.xlu0 %2380 }
 0x292   : > { %3657 = vmatmul.mubr.msk.f32.gmra.mxu0 %vm574_vm0, %v2248_v33  ;;  %v2386_v59 = vpop.permute.xlu1 %2385 }
 0x293   : > { %3659 = vmatprep.mubr.msk.f32.mxu0 %vm574_vm0, %v2249_v44  ;;  %v2391_v39 = vpop.permute.xlu0 %2390 }
 0x296   : > { %3660 = vmatmul.mubr.msk.f32.gmra.mxu0 %vm574_vm0, %v2250_v42  ;;  %v2396_v50 = vpop.permute.xlu1 %2395 }
 0x297   : > { %v2401_v30 = vpop.permute.xlu0 %2400 }
 0x33a   : > { %v3640_v46 = vpop.f32.mrf.mxu0  ;;  %v3664_v27 = vpop.f32.mrf.mxu1 }
 0x33b   : > { %v2547_v57 = vadd.f32 %v3640_v46, %v2291_v2  ;;  %v2627_v40 = vadd.f32 %v3664_v27, %v2371_v31 }
 0x33c   : > { %v2541_v11 = vpop.f32.mrf.mxu0  ;;  %v2621_v15 = vpop.f32.mrf.mxu1 }
 0x33d   : > { %v2661_v4 = vmax.f32 %v2547_v57, 0.0  ;;  %v2677_v56 = vmax.f32 %v2627_v40, 0.0  ;;  %v2542_v26 = vadd.f32 %v2541_v11, %v2286_v48  ;;  %v2622_v6 = vadd.f32 %v2621_v15, %v2366_v36 }
 0x33e   : > { %v3643_v62 = vpop.f32.mrf.mxu0  ;;  %v3667_v10 = vpop.f32.mrf.mxu1 }
 0x33f   : > { %2685 = vst.msk [vmem:[%s5702_s26 + $0x8] sm:$0xff] %vm525_vm1, %v2661_v4  ;;  %2701 = vst.msk [vmem:[%s5702_s26 + $0x88] sm:$0xff] %vm525_vm1, %v2677_v56  ;;  %v2660_v23 = vmax.f32 %v2542_v26, 0.0  ;;  %v2676_v20 = vmax.f32 %v2622_v6, 0.0  ;;  %v2557_v24 = vadd.f32 %v3643_v62, %v2301_v43  ;;  %v2637_v35 = vadd.f32 %v3667_v10, %v2381_v45 }
 0x340   : > { %v2551_v51 = vpop.f32.mrf.mxu0  ;;  %v2631_v12 = vpop.f32.mrf.mxu1 }
 0x341   : > { %2684 = vst.msk [vmem:[%s5702_s26] sm:$0xff] %vm525_vm1, %v2660_v23  ;;  %2700 = vst.msk [vmem:[%s5702_s26 + $0x80] sm:$0xff] %vm525_vm1, %v2676_v20  ;;  %v2663_v9 = vmax.f32 %v2557_v24, 0.0  ;;  %v2679_v16 = vmax.f32 %v2637_v35, 0.0  ;;  %v2552_v54 = vadd.f32 %v2551_v51, %v2296_v41  ;;  %v2632_v1 = vadd.f32 %v2631_v12, %v2376_v28 }
 0x342   : > { %v3646_v63 = vpop.f32.mrf.mxu0  ;;  %v3670_v60 = vpop.f32.mrf.mxu1 }
 0x343   : > { %2687 = vst.msk [vmem:[%s5702_s26 + $0x18] sm:$0xff] %vm525_vm1, %v2663_v9  ;;  %2703 = vst.msk [vmem:[%s5702_s26 + $0x98] sm:$0xff] %vm525_vm1, %v2679_v16  ;;  %v2662_v13 = vmax.f32 %v2552_v54, 0.0  ;;  %v2678_v47 = vmax.f32 %v2632_v1, 0.0  ;;  %v2567_v32 = vadd.f32 %v3646_v63, %v2311_v34  ;;  %v2647_v18 = vadd.f32 %v3670_v60, %v2391_v39 }
 0x344   : > { %v2561_v17 = vpop.f32.mrf.mxu0  ;;  %v2641_v5 = vpop.f32.mrf.mxu1 }
 0x345   : > { %2686 = vst.msk [vmem:[%s5702_s26 + $0x10] sm:$0xff] %vm525_vm1, %v2662_v13  ;;  %2702 = vst.msk [vmem:[%s5702_s26 + $0x90] sm:$0xff] %vm525_vm1, %v2678_v47  ;;  %v2665_v53 = vmax.f32 %v2567_v32, 0.0  ;;  %v2681_v52 = vmax.f32 %v2647_v18, 0.0  ;;  %v2562_v55 = vadd.f32 %v2561_v17, %v5675_v22  ;;  %v2642_v0 = vadd.f32 %v2641_v5, %v2386_v59 }
 0x346   : > { %v3649_v25 = vpop.f32.mrf.mxu0  ;;  %v3673_v58 = vpop.f32.mrf.mxu1 }
 0x347   : > { %2689 = vst.msk [vmem:[%s5702_s26 + $0x28] sm:$0xff] %vm525_vm1, %v2665_v53  ;;  %2705 = vst.msk [vmem:[%s5702_s26 + $0xa8] sm:$0xff] %vm525_vm1, %v2681_v52  ;;  %v2664_v37 = vmax.f32 %v2562_v55, 0.0  ;;  %v2680_v33 = vmax.f32 %v2642_v0, 0.0  ;;  %v2577_v44 = vadd.f32 %v3649_v25, %v5677_v38  ;;  %v2657_v42 = vadd.f32 %v3673_v58, %v2401_v30 }
 0x348   : > { %v2571_v2 = vpop.f32.mrf.mxu0  ;;  %v2651_v48 = vpop.f32.mrf.mxu1 }
 0x349   : > { %2688 = vst.msk [vmem:[%s5702_s26 + $0x20] sm:$0xff] %vm525_vm1, %v2664_v37  ;;  %2704 = vst.msk [vmem:[%s5702_s26 + $0xa0] sm:$0xff] %vm525_vm1, %v2680_v33  ;;  %v2667_v43 = vmax.f32 %v2577_v44, 0.0  ;;  %v2683_v41 = vmax.f32 %v2657_v42, 0.0  ;;  %v2572_v34 = vadd.f32 %v2571_v2, %v5679_v61  ;;  %v2652_v22 = vadd.f32 %v2651_v48, %v2396_v50 }
 0x34a   : > { %v3652_v31 = vpop.f32.mrf.mxu0 }
 0x34b   : > { %2691 = vst.msk [vmem:[%s5702_s26 + $0x38] sm:$0xff] %vm525_vm1, %v2667_v43  ;;  %2707 = vst.msk [vmem:[%s5702_s26 + $0xb8] sm:$0xff] %vm525_vm1, %v2683_v41  ;;  %v2666_v38 = vmax.f32 %v2572_v34, 0.0  ;;  %v2682_v36 = vmax.f32 %v2652_v22, 0.0  ;;  %v2587_v45 = vadd.f32 %v3652_v31, %v5681_v21 }
 0x34c   : > { %v2581_v46 = vpop.f32.mrf.mxu0 }
 0x34d   : > { %2690 = vst.msk [vmem:[%s5702_s26 + $0x30] sm:$0xff] %vm525_vm1, %v2666_v38  ;;  %2706 = vst.msk [vmem:[%s5702_s26 + $0xb0] sm:$0xff] %vm525_vm1, %v2682_v36  ;;  %v2669_v27 = vmax.f32 %v2587_v45, 0.0  ;;  %v2582_v61 = vadd.f32 %v2581_v46, %v5683_v7 }
 0x34e   : > { %v3655_v28 = vpop.f32.mrf.mxu0 }
 0x34f   : > { %2693 = vst.msk [vmem:[%s5702_s26 + $0x48] sm:$0xff] %vm525_vm1, %v2669_v27  ;;  %v2668_v57 = vmax.f32 %v2582_v61, 0.0  ;;  %v2597_v40 = vadd.f32 %v3655_v28, %v5685_v8 }
 0x350   : > { %v2591_v11 = vpop.f32.mrf.mxu0 }
 0x351   : > { %2692 = vst.msk [vmem:[%s5702_s26 + $0x40] sm:$0xff] %vm525_vm1, %v2668_v57  ;;  %v2671_v21 = vmax.f32 %v2597_v40, 0.0  ;;  %v2592_v15 = vadd.f32 %v2591_v11, %v5687_v3 }
 0x352   : > { %v3658_v4 = vpop.f32.mrf.mxu0 }
 0x353   : > { %2695 = vst.msk [vmem:[%s5702_s26 + $0x58] sm:$0xff] %vm525_vm1, %v2671_v21  ;;  %v2670_v56 = vmax.f32 %v2592_v15, 0.0  ;;  %v2607_v7 = vadd.f32 %v3658_v4, %v5689_v19 }
 0x354   : > { %v2601_v26 = vpop.f32.mrf.mxu0 }
 0x355   : > { %2694 = vst.msk [vmem:[%s5702_s26 + $0x50] sm:$0xff] %vm525_vm1, %v2670_v56  ;;  %v2673_v6 = vmax.f32 %v2607_v7, 0.0  ;;  %v2602_v8 = vadd.f32 %v2601_v26, %v5691_v49 }
 0x356   : > { %v3661_v62 = vpop.f32.mrf.mxu0 }
 0x357   : > { %2697 = vst.msk [vmem:[%s5702_s26 + $0x68] sm:$0xff] %vm525_vm1, %v2673_v6  ;;  %v2672_v10 = vmax.f32 %v2602_v8, 0.0  ;;  %v2617_v3 = vadd.f32 %v3661_v62, %v5693_v29 }
 0x358   : > { %v2611_v39 = vpop.f32.mrf.mxu0 }
 0x359   : > { %2696 = vst.msk [vmem:[%s5702_s26 + $0x60] sm:$0xff] %vm525_vm1, %v2672_v10  ;;  %v2675_v23 = vmax.f32 %v2617_v3, 0.0  ;;  %v2612_v20 = vadd.f32 %v2611_v39, %v5697_v14 }
 0x35b   : > { %2699 = vst.msk [vmem:[%s5702_s26 + $0x78] sm:$0xff] %vm525_vm1, %v2675_v23  ;;  %v2674_v19 = vmax.f32 %v2612_v20, 0.0 }
 0x35d   : > { %2698 = vst.msk [vmem:[%s5702_s26 + $0x70] sm:$0xff] %vm525_vm1, %v2674_v19 }
 0x35e PF: > { %s21_s13 = sadd.s32 1, %s3759_s13  }
 0x35f   : > { %p18_p5 = scmp.ge.s32.totalorder %s21_s13, 4  }
 0x361   :  { %20 = sbr.rel (!%p18_p5) target bundleno = 1 (0x1), region = 106 }

</bundles_post_ra>
